<compile_context>
chip_gen: v6e
topology: v6e:2x2x1
jax: 0.10.0
libtpu: 0.0.40
codegen_flags: <defaults>
</compile_context>

<pallas_src>
import functools

import jax
import jax.numpy as jnp
from jax.experimental import pallas as pl
from jax.experimental.pallas import tpu as pltpu


def _round_up(x, m):
    return (x + m - 1) // m * m


# ------------------------- fused per-layer LSTM kernel ------------------------------

def _lstm_layer_kernel(x_ref, wih_hbm, whh_hbm, b_ref, h0_ref, c0_ref,    # inputs
                       y_ref, hn_ref, cn_ref,                              # outputs
                       wih_vmem, whh_vmem, dma_sems, xw_s, h_s, c_s,       # scratch
                       *, hp, bp, ts, t_total):
    tc = pl.program_id(0)
    needs_mask = (t_total % ts) != 0                     # static Python bool

    @pl.when(tc == 0)
    def _():
        # One-time weight loads (single-buffered, resident for the whole sequence).
        cp_ih = pltpu.make_async_copy(wih_hbm, wih_vmem, dma_sems.at[0])
        cp_hh = pltpu.make_async_copy(whh_hbm, whh_vmem, dma_sems.at[1])
        cp_ih.start()
        cp_hh.start()
        # Init the recurrent state while the weight DMAs are in flight.
        h_s[...] = h0_ref[...]
        c_s[...] = c0_ref[...]
        cp_ih.wait()
        cp_hh.wait()

    # Input projection for the whole chunk: ONE well-filled (ts*Bp, Din) MXU GEMM.
    x = x_ref[...].astype(wih_vmem.dtype)                                  # (ts*Bp, Din)
    xw_s[...] = (jnp.dot(x, wih_vmem[...], preferred_element_type=jnp.float32)
                 + b_ref[...])                                             # (ts*Bp, 4Hp) f32

    # Recurrent steps: fully unrolled with static indices; only h @ W_hh^T is sequential.
    for s in range(ts):
        h = h_s[...]                                                       # (Bp, Hp) f32
        c = c_s[...]
        gates = xw_s[s * bp:(s + 1) * bp, :] + jnp.dot(
            h.astype(whh_vmem.dtype), whh_vmem[...],
            preferred_element_type=jnp.float32)                            # (Bp, 4Hp) f32
        # Packed gate layout [i | f | o | g]: sigmoid(x) == 0.5*(tanh(x/2)+1), so the 3Hp
        # sigmoid block is a single tanh pass; g is a second tanh pass.
        sig = 0.5 * (jnp.tanh(0.5 * gates[:, :3 * hp]) + 1.0)
        i_g = sig[:, 0:hp]
        f_g = sig[:, hp:2 * hp]
        o_g = sig[:, 2 * hp:3 * hp]
        g_g = jnp.tanh(gates[:, 3 * hp:])
        c_new = f_g * c + i_g * g_g
        h_new = o_g * jnp.tanh(c_new)
        if needs_mask:                                   # masked final chunk (odd T)
            valid = (tc * ts + s) < t_total
            c_new = jnp.where(valid, c_new, c)
            h_new = jnp.where(valid, h_new, h)
        h_s[...] = h_new
        c_s[...] = c_new
        y_ref[s * bp:(s + 1) * bp, :] = h_new.astype(y_ref.dtype)

    @pl.when(tc == pl.num_programs(0) - 1)
    def _():
        hn_ref[...] = h_s[...]
        cn_ref[...] = c_s[...]


def _vmem_limit_bytes(din, hp, bp, ts, x_itemsize):
    hp4 = 4 * hp
    est = (din * hp4 * 2 + hp * hp4 * 2        # resident bf16 weights
           + ts * bp * hp4 * 4                 # xw scratch (f32)
           + 2 * ts * bp * din * x_itemsize    # x double-buffer
           + 2 * ts * bp * hp * 2              # y double-buffer (bf16)
           + 2 * bp * hp * 4                   # h/c state
           + 4 * bp * hp * 4 + hp4 * 4)        # h0/c0/hn/cn blocks + bias
    return int(min(max(2 * est, 32 * 1024 * 1024), 96 * 1024 * 1024))


def lstm_layer(x_flat_tm, w_ih_t, w_hh_t, b, h0, c0, *, ts, t_total, bp):
    """x_flat_tm: (T_pad*Bp, Din) bf16 time-major-flat layer input.
    Returns (y: (T_pad*Bp, Hp) bf16, hn: (Bp, Hp) f32, cn: (Bp, Hp) f32)."""
    M, din = x_flat_tm.shape
    hp4 = w_ih_t.shape[-1]
    hp = hp4 // 4
    nchunks = M // (ts * bp)
    kernel = functools.partial(_lstm_layer_kernel, hp=hp, bp=bp, ts=ts, t_total=t_total)
    # TODO(synk): on v7x with very large Hp, split W_hh^T along the gate axis (or use fp8)
    #             to fit the 64 MiB VMEM; not needed at these sizes.
    return pl.pallas_call(
        kernel,
        out_shape=(jax.ShapeDtypeStruct((M, hp), jnp.bfloat16),    # y (time-major, flat)
                   jax.ShapeDtypeStruct((bp, hp), jnp.float32),    # hn
                   jax.ShapeDtypeStruct((bp, hp), jnp.float32)),   # cn
        grid=(nchunks,),
        in_specs=[
            pl.BlockSpec((ts * bp, din), lambda tc: (tc, 0)),      # layer input chunk
            pl.BlockSpec(memory_space=pl.ANY),                     # W_ih^T (manual DMA once)
            pl.BlockSpec(memory_space=pl.ANY),                     # W_hh^T (manual DMA once)
            pl.BlockSpec((1, hp4), lambda tc: (0, 0)),             # bias
            pl.BlockSpec((bp, hp), lambda tc: (0, 0)),             # h0
            pl.BlockSpec((bp, hp), lambda tc: (0, 0)),             # c0
        ],
        out_specs=(
            pl.BlockSpec((ts * bp, hp), lambda tc: (tc, 0)),       # y chunk (lane-dense)
            pl.BlockSpec((bp, hp), lambda tc: (0, 0)),             # hn (written last chunk)
            pl.BlockSpec((bp, hp), lambda tc: (0, 0)),             # cn (written last chunk)
        ),
        scratch_shapes=[
            pltpu.VMEM((din, hp4), jnp.bfloat16),                  # resident W_ih^T
            pltpu.VMEM((hp, hp4), jnp.bfloat16),                   # resident W_hh^T
            pltpu.SemaphoreType.DMA((2,)),
            pltpu.VMEM((ts * bp, hp4), jnp.float32),               # chunk gate pre-acts
            pltpu.VMEM((bp, hp), jnp.float32),                     # h state
            pltpu.VMEM((bp, hp), jnp.float32),                     # c state
        ],
        compiler_params=pltpu.CompilerParams(
            dimension_semantics=("arbitrary",),                    # time is sequential
            vmem_limit_bytes=_vmem_limit_bytes(din, hp, bp, ts,
                                               x_flat_tm.dtype.itemsize)),
    )(x_flat_tm, w_ih_t, w_hh_t, b, h0, c0)


# --------------------------------- final Linear ------------------------------------

def _linear_kernel(x_ref, w_ref, b_ref, o_ref):
    o_ref[...] = (jnp.dot(x_ref[...], w_ref[...],
                          preferred_element_type=jnp.float32) + b_ref[...])


def linear(x, w_t, b):
    """x: (Bp, Hp) f32, w_t: (Hp, O) f32, b: (1, O) f32 -> (Bp, O) f32."""
    Bp, Hp = x.shape
    O = w_t.shape[-1]
    return pl.pallas_call(
        _linear_kernel,
        out_shape=jax.ShapeDtypeStruct((Bp, O), jnp.float32),
        in_specs=[pl.BlockSpec((Bp, Hp), lambda: (0, 0)),
                  pl.BlockSpec((Hp, O), lambda: (0, 0)),
                  pl.BlockSpec((1, O), lambda: (0, 0))],
        out_specs=pl.BlockSpec((Bp, O), lambda: (0, 0)),
    )(x, w_t, b)


# --------------------------------- full forward ------------------------------------

def lstm_model_forward(x_btd, params, h0=None, c0=None, ts=16):
    """x_btd: (B, T, input_sz). Returns (out:(B,O), hn:(L,B,H), cn:(L,B,H))."""
    B, T, _ = x_btd.shape
    layers = params["layers"]
    L = len(layers)
    H = params["hidden_sz"]
    Hp = params["hidden_pad"]
    Bp = _round_up(B, 16)                 # 16 sublanes: bf16 y/x blocks stay tile-aligned

    ts = max(1, min(ts, T))
    nchunks = -(-T // ts)                 # odd T handled by a masked final chunk
    T_pad = nchunks * ts

    if h0 is None or c0 is None:
        h0 = jnp.zeros((L, B, H), jnp.float32)
        c0 = jnp.zeros((L, B, H), jnp.float32)
    h0p = jnp.pad(h0, ((0, 0), (0, Bp - B), (0, Hp - H)))
    c0p = jnp.pad(c0, ((0, 0), (0, Bp - B), (0, Hp - H)))

    # Single transpose to time-major, flattened (T_pad*Bp, Din), bf16 (the MXU operand
    # dtype; matches the reference numerics which cast x to bf16 for the matmul anyway).
    xp = jnp.pad(x_btd, ((0, Bp - B), (0, T_pad - T), (0, 0)))
    y = jnp.transpose(xp, (1, 0, 2)).reshape(T_pad * Bp, -1).astype(jnp.bfloat16)

    hn_list, cn_list = [], []
    last_hn = None
    for l, lp in enumerate(layers):
        y, hn_l, cn_l = lstm_layer(y, lp["w_ih_t"], lp["w_hh_t"], lp["b"],
                                   h0p[l], c0p[l], ts=ts, t_total=T, bp=Bp)
        hn_list.append(hn_l[:B, :H])
        cn_list.append(cn_l[:B, :H])
        last_hn = hn_l
    # TODO(synk): inter-layer dropout (module default p=0.0) is not implemented.
    # TODO(synk): on v7x with Bp>=32, add a parallel batch grid axis so the second
    #             TensorCore runs an independent half-batch LSTM; not useful at Bp=16.

    hn = jnp.stack(hn_list, axis=0)
    cn = jnp.stack(cn_list, axis=0)
    out = linear(last_hn, params["lin_w_t"], params["lin_b"])[:B]
    return out, hn, cn


# ------------------------------ parameter handling ---------------------------------

def init_params(key, input_sz, hidden_sz, n_layers, output_dim):
    """Raw PyTorch-layout params (gate order i, f, g, o)."""
    k = 1.0 / jnp.sqrt(jnp.float32(hidden_sz))
    layers = []
    for l in range(n_layers):
        d_in = input_sz if l == 0 else hidden_sz
        key, k1, k2, k3, k4 = jax.random.split(key, 5)
        layers.append(dict(
            w_ih=jax.random.uniform(k1, (4 * hidden_sz, d_in), jnp.float32, -k, k),
            w_hh=jax.random.uniform(k2, (4 * hidden_sz, hidden_sz), jnp.float32, -k, k),
            b_ih=jax.random.uniform(k3, (4 * hidden_sz,), jnp.float32, -k, k),
            b_hh=jax.random.uniform(k4, (4 * hidden_sz,), jnp.float32, -k, k)))
    key, k5, k6 = jax.random.split(key, 3)
    lin_w = jax.random.uniform(k5, (output_dim, hidden_sz), jnp.float32, -k, k)
    lin_b = jax.random.uniform(k6, (output_dim,), jnp.float32, -k, k)
    return dict(layers=layers, lin_w=lin_w, lin_b=lin_b)


def pack_params(raw, hidden_sz):
    """Kernel-ready params: gates permuted to [i,f,o,g], H padded to 128, bf16 weights."""
    H = hidden_sz
    Hp = _round_up(H, 128)

    def permute_pad(a):        # (..., 4H) -> (..., 4Hp), gate order i,f,g,o -> i,f,o,g
        i, f, g, o = jnp.split(a, 4, axis=-1)
        pad = [(0, 0)] * (a.ndim - 1) + [(0, Hp - H)]
        return jnp.concatenate([jnp.pad(blk, pad) for blk in (i, f, o, g)], axis=-1)

    layers = []
    for l, lp in enumerate(raw["layers"]):
        w_ih_t = permute_pad(lp["w_ih"].T)                                  # (Din, 4Hp)
        if l > 0:                                                           # input is Hp wide
            w_ih_t = jnp.pad(w_ih_t, ((0, Hp - H), (0, 0)))
        w_hh_t = jnp.pad(permute_pad(lp["w_hh"].T), ((0, Hp - H), (0, 0)))  # (Hp, 4Hp)
        b = permute_pad((lp["b_ih"] + lp["b_hh"])[None, :])                 # (1, 4Hp) f32
        layers.append(dict(w_ih_t=w_ih_t.astype(jnp.bfloat16),
                           w_hh_t=w_hh_t.astype(jnp.bfloat16),
                           b=b))
    lin_w_t = jnp.pad(raw["lin_w"].T, ((0, Hp - H), (0, 0)))                # (Hp, O) f32
    return dict(layers=layers, lin_w_t=lin_w_t, lin_b=raw["lin_b"][None, :],
                hidden_sz=H, hidden_pad=Hp)


# ------------------------------ pure-JAX reference ----------------------------------

def reference_forward(x_btd, raw, hidden_sz, matmul_dtype=jnp.float32):
    """PyTorch-faithful reference (gate order i,f,g,o). matmul_dtype=bfloat16 emulates the
    kernel's MXU numerics (bf16 operands, f32 accumulation); float32 is exact f32 math."""
    B, T, _ = x_btd.shape
    H = hidden_sz
    y = x_btd
    hn_list, cn_list = [], []
    for lp in raw["layers"]:
        wih = lp["w_ih"].T.astype(matmul_dtype)
        whh = lp["w_hh"].T.astype(matmul_dtype)
        bias = lp["b_ih"] + lp["b_hh"]
        h = jnp.zeros((B, H), jnp.float32)
        c = jnp.zeros((B, H), jnp.float32)
        outs = []
        for t in range(T):
            xt = y[:, t, :].astype(matmul_dtype)
            g = (jnp.dot(xt, wih, preferred_element_type=jnp.float32) + bias
                 + jnp.dot(h.astype(matmul_dtype), whh,
                           preferred_element_type=jnp.float32))
            i = jax.nn.sigmoid(g[:, 0:H])
            f = jax.nn.sigmoid(g[:, H:2 * H])
            gg = jnp.tanh(g[:, 2 * H:3 * H])
            o = jax.nn.sigmoid(g[:, 3 * H:4 * H])
            c = f * c + i * gg
            h = o * jnp.tanh(c)
            outs.append(h)
        y = jnp.stack(outs, axis=1)
        hn_list.append(h)
        cn_list.append(c)
    out = y[:, -1, :] @ raw["lin_w"].T + raw["lin_b"]
    return out, jnp.stack(hn_list, 0), jnp.stack(cn_list, 0)


# ------------------------------------- main ------------------------------------------

if __name__ == "__main__":
    B, T = 2, 8
    input_sz, hidden_sz, n_layers, output_dim = 16, 32, 2, 4

    key = jax.random.PRNGKey(0)
    kx, kp = jax.random.split(key)
    x = jax.random.normal(kx, (B, T, input_sz), jnp.float32)

    raw = init_params(kp, input_sz, hidden_sz, n_layers, output_dim)
    params = pack_params(raw, hidden_sz)

    # References: bf16-operand / f32-accumulate (matches kernel MXU numerics) + exact f32.
    o_bf, h_bf, c_bf = reference_forward(x, raw, hidden_sz, jnp.bfloat16)
    o32, h32, c32 = reference_forward(x, raw, hidden_sz, jnp.float32)

    for ts in (4, 5):          # ts=4 divides T; ts=5 exercises the masked final chunk
        out, hn, cn = lstm_model_forward(x, params, ts=ts)
        jax.block_until_ready((out, hn, cn))

        assert out.shape == (B, output_dim)
        assert hn.shape == (n_layers, B, hidden_sz)
        assert cn.shape == (n_layers, B, hidden_sz)

        # Tight check vs. a reference using the same bf16-operand / f32-accumulate numerics.
        assert jnp.allclose(out, o_bf, atol=2e-3, rtol=2e-3)
        assert jnp.allclose(hn, h_bf, atol=2e-3, rtol=2e-3)
        assert jnp.allclose(cn, c_bf, atol=2e-3, rtol=2e-3)

        # Looser sanity check vs. exact f32 PyTorch-equivalent math.
        assert jnp.allclose(out, o32, atol=5e-2, rtol=5e-2)
        assert jnp.allclose(hn, h32, atol=5e-2, rtol=5e-2)
        assert jnp.allclose(cn, c32, atol=5e-2, rtol=5e-2)

    print("KERNEL_OK")
</pallas_src>

<mosaic_0001>
module attributes {stable_mosaic.version = 11 : i64} {
  func.func @_lstm_layer_kernel(%arg0: i32, %arg1: memref<64x16xbf16, #tpu.memory_space<vmem>>, %arg2: memref<16x512xbf16, #tpu.memory_space<any>>, %arg3: memref<128x512xbf16, #tpu.memory_space<any>>, %arg4: memref<1x512xf32, #tpu.memory_space<vmem>>, %arg5: memref<16x128xf32, #tpu.memory_space<vmem>>, %arg6: memref<16x128xf32, #tpu.memory_space<vmem>>, %arg7: memref<64x128xbf16, #tpu.memory_space<vmem>>, %arg8: memref<16x128xf32, #tpu.memory_space<vmem>>, %arg9: memref<16x128xf32, #tpu.memory_space<vmem>>, %arg10: memref<16x512xbf16, #tpu.memory_space<vmem>>, %arg11: memref<128x512xbf16, #tpu.memory_space<vmem>>, %arg12: memref<2x!tpu.dma_semaphore, #tpu.memory_space<semaphore_mem>>, %arg13: memref<64x512xf32, #tpu.memory_space<vmem>>, %arg14: memref<16x128xf32, #tpu.memory_space<vmem>>, %arg15: memref<16x128xf32, #tpu.memory_space<vmem>>) attributes {dimension_semantics = [#tpu.dimension_semantics<arbitrary>], iteration_bounds = array<i64: 2>, scalar_prefetch = 0 : i64, scratch_operands = 6 : i64, tpu.core_type = #tpu.core_type<tc>, window_params = [{transform_indices = @transform_0, window_bounds = array<i64: 64, 16>}, {}, {}, {pipeline_mode = #tpu.pipeline_mode<synchronous>, transform_indices = @transform_3, window_bounds = array<i64: 1, 512>}, {pipeline_mode = #tpu.pipeline_mode<synchronous>, transform_indices = @transform_4, window_bounds = array<i64: 16, 128>}, {pipeline_mode = #tpu.pipeline_mode<synchronous>, transform_indices = @transform_5, window_bounds = array<i64: 16, 128>}, {transform_indices = @transform_6, window_bounds = array<i64: 64, 128>}, {pipeline_mode = #tpu.pipeline_mode<synchronous>, transform_indices = @transform_7, window_bounds = array<i64: 16, 128>}, {pipeline_mode = #tpu.pipeline_mode<synchronous>, transform_indices = @transform_8, window_bounds = array<i64: 16, 128>}]} {
    %c0_i32 = arith.constant 0 : i32
    %0 = arith.cmpi eq, %arg0, %c0_i32 : i32
    %1 = arith.extui %0 : i1 to i32
    %c0_i32_0 = arith.constant 0 : i32
    %2 = arith.cmpi ne, %1, %c0_i32_0 : i32
    scf.if %2 {
      %c0_i32_78 = arith.constant 0 : i32
      %129 = tpu.memref_slice %arg12[%c0_i32_78] : memref<2x!tpu.dma_semaphore, #tpu.memory_space<semaphore_mem>> -> memref<1x!tpu.dma_semaphore, #tpu.memory_space<semaphore_mem>>
      %130 = tpu.memref_squeeze %129 : memref<1x!tpu.dma_semaphore, #tpu.memory_space<semaphore_mem>> -> memref<!tpu.dma_semaphore, #tpu.memory_space<semaphore_mem>>
      tpu.enqueue_dma source(%arg2 : memref<16x512xbf16, #tpu.memory_space<any>>) target(%arg10 : memref<16x512xbf16, #tpu.memory_space<vmem>>) target_semaphore(%130 : memref<!tpu.dma_semaphore, #tpu.memory_space<semaphore_mem>>)
      %c1_i32_79 = arith.constant 1 : i32
      %131 = tpu.memref_slice %arg12[%c1_i32_79] : memref<2x!tpu.dma_semaphore, #tpu.memory_space<semaphore_mem>> -> memref<1x!tpu.dma_semaphore, #tpu.memory_space<semaphore_mem>>
      %132 = tpu.memref_squeeze %131 : memref<1x!tpu.dma_semaphore, #tpu.memory_space<semaphore_mem>> -> memref<!tpu.dma_semaphore, #tpu.memory_space<semaphore_mem>>
      tpu.enqueue_dma source(%arg3 : memref<128x512xbf16, #tpu.memory_space<any>>) target(%arg11 : memref<128x512xbf16, #tpu.memory_space<vmem>>) target_semaphore(%132 : memref<!tpu.dma_semaphore, #tpu.memory_space<semaphore_mem>>)
      %c0_80 = arith.constant 0 : index
      %c0_81 = arith.constant 0 : index
      %133 = vector.load %arg5[%c0_80, %c0_81] : memref<16x128xf32, #tpu.memory_space<vmem>>, vector<16x128xf32>
      %c0_82 = arith.constant 0 : index
      %c0_83 = arith.constant 0 : index
      %134 = vector.load %arg14[%c0_82, %c0_83] : memref<16x128xf32, #tpu.memory_space<vmem>>, vector<16x128xf32>
      tpu.vector_store %arg14[%c0_82, %c0_83], %133 {strides = array<i32>} : memref<16x128xf32, #tpu.memory_space<vmem>>, vector<16x128xf32>,
      %c0_84 = arith.constant 0 : index
      %c0_85 = arith.constant 0 : index
      %135 = vector.load %arg6[%c0_84, %c0_85] : memref<16x128xf32, #tpu.memory_space<vmem>>, vector<16x128xf32>
      %c0_86 = arith.constant 0 : index
      %c0_87 = arith.constant 0 : index
      %136 = vector.load %arg15[%c0_86, %c0_87] : memref<16x128xf32, #tpu.memory_space<vmem>>, vector<16x128xf32>
      tpu.vector_store %arg15[%c0_86, %c0_87], %135 {strides = array<i32>} : memref<16x128xf32, #tpu.memory_space<vmem>>, vector<16x128xf32>,
      %c0_i32_88 = arith.constant 0 : i32
      %137 = tpu.memref_slice %arg12[%c0_i32_88] : memref<2x!tpu.dma_semaphore, #tpu.memory_space<semaphore_mem>> -> memref<1x!tpu.dma_semaphore, #tpu.memory_space<semaphore_mem>>
      %138 = tpu.memref_squeeze %137 : memref<1x!tpu.dma_semaphore, #tpu.memory_space<semaphore_mem>> -> memref<!tpu.dma_semaphore, #tpu.memory_space<semaphore_mem>>
      tpu.wait_dma2 semaphore(%138 : memref<!tpu.dma_semaphore, #tpu.memory_space<semaphore_mem>>) src(%arg2 : memref<16x512xbf16, #tpu.memory_space<any>>) dst(%arg10 : memref<16x512xbf16, #tpu.memory_space<vmem>>)
      %c1_i32_89 = arith.constant 1 : i32
      %139 = tpu.memref_slice %arg12[%c1_i32_89] : memref<2x!tpu.dma_semaphore, #tpu.memory_space<semaphore_mem>> -> memref<1x!tpu.dma_semaphore, #tpu.memory_space<semaphore_mem>>
      %140 = tpu.memref_squeeze %139 : memref<1x!tpu.dma_semaphore, #tpu.memory_space<semaphore_mem>> -> memref<!tpu.dma_semaphore, #tpu.memory_space<semaphore_mem>>
      tpu.wait_dma2 semaphore(%140 : memref<!tpu.dma_semaphore, #tpu.memory_space<semaphore_mem>>) src(%arg3 : memref<128x512xbf16, #tpu.memory_space<any>>) dst(%arg11 : memref<128x512xbf16, #tpu.memory_space<vmem>>)
    } else {
    }
    %c0 = arith.constant 0 : index
    %c0_1 = arith.constant 0 : index
    %3 = vector.load %arg1[%c0, %c0_1] : memref<64x16xbf16, #tpu.memory_space<vmem>>, vector<64x16xbf16>
    %c0_2 = arith.constant 0 : index
    %c0_3 = arith.constant 0 : index
    %4 = vector.load %arg10[%c0_2, %c0_3] : memref<16x512xbf16, #tpu.memory_space<vmem>>, vector<16x512xbf16>
    %cst = arith.constant dense<0.000000e+00> : vector<64x512xf32>
    %5 = tpu.matmul %3, %4, %cst {dimension_numbers = #tpu.dot_dimension_numbers<[1], [0], [0], [1], [0, 0, 1, 1], [], []>} : vector<64x16xbf16>, vector<16x512xbf16>, vector<64x512xf32> -> vector<64x512xf32>
    %c0_4 = arith.constant 0 : index
    %c0_5 = arith.constant 0 : index
    %6 = vector.load %arg4[%c0_4, %c0_5] : memref<1x512xf32, #tpu.memory_space<vmem>>, vector<1x512xf32>
    %7 = vector.broadcast %6 : vector<1x512xf32> to vector<64x512xf32>
    %8 = arith.addf %5, %7 : vector<64x512xf32>
    %c0_6 = arith.constant 0 : index
    %c0_7 = arith.constant 0 : index
    %9 = vector.load %arg13[%c0_6, %c0_7] : memref<64x512xf32, #tpu.memory_space<vmem>>, vector<64x512xf32>
    tpu.vector_store %arg13[%c0_6, %c0_7], %8 {strides = array<i32>} : memref<64x512xf32, #tpu.memory_space<vmem>>, vector<64x512xf32>,
    %c0_8 = arith.constant 0 : index
    %c0_9 = arith.constant 0 : index
    %10 = vector.load %arg14[%c0_8, %c0_9] : memref<16x128xf32, #tpu.memory_space<vmem>>, vector<16x128xf32>
    %c0_10 = arith.constant 0 : index
    %c0_11 = arith.constant 0 : index
    %11 = vector.load %arg15[%c0_10, %c0_11] : memref<16x128xf32, #tpu.memory_space<vmem>>, vector<16x128xf32>
    %c0_12 = arith.constant 0 : index
    %c0_13 = arith.constant 0 : index
    %12 = vector.load %arg13[%c0_12, %c0_13] : memref<64x512xf32, #tpu.memory_space<vmem>>, vector<16x512xf32>
    %13 = arith.truncf %10 : vector<16x128xf32> to vector<16x128xbf16>
    %c0_14 = arith.constant 0 : index
    %c0_15 = arith.constant 0 : index
    %14 = vector.load %arg11[%c0_14, %c0_15] : memref<128x512xbf16, #tpu.memory_space<vmem>>, vector<128x512xbf16>
    %cst_16 = arith.constant dense<0.000000e+00> : vector<16x512xf32>
    %15 = tpu.matmul %13, %14, %cst_16 {dimension_numbers = #tpu.dot_dimension_numbers<[1], [0], [0], [1], [0, 0, 1, 1], [], []>} : vector<16x128xbf16>, vector<128x512xbf16>, vector<16x512xf32> -> vector<16x512xf32>
    %16 = arith.addf %12, %15 : vector<16x512xf32>
    %17 = vector.extract_strided_slice %16 {offsets = [0, 0], sizes = [16, 384], strides = [1, 1]} : vector<16x512xf32> to vector<16x384xf32>
    %cst_17 = arith.constant 5.000000e-01 : f32
    %18 = vector.broadcast %cst_17 : f32 to vector<16x384xf32>
    %19 = arith.mulf %18, %17 : vector<16x384xf32>
    %20 = math.tanh %19 : vector<16x384xf32>
    %cst_18 = arith.constant 1.000000e+00 : f32
    %21 = vector.broadcast %cst_18 : f32 to vector<16x384xf32>
    %22 = arith.addf %20, %21 : vector<16x384xf32>
    %cst_19 = arith.constant 5.000000e-01 : f32
    %23 = vector.broadcast %cst_19 : f32 to vector<16x384xf32>
    %24 = arith.mulf %23, %22 : vector<16x384xf32>
    %25 = vector.extract_strided_slice %24 {offsets = [0, 0], sizes = [16, 128], strides = [1, 1]} : vector<16x384xf32> to vector<16x128xf32>
    %26 = vector.extract_strided_slice %24 {offsets = [0, 128], sizes = [16, 128], strides = [1, 1]} : vector<16x384xf32> to vector<16x128xf32>
    %27 = vector.extract_strided_slice %24 {offsets = [0, 256], sizes = [16, 128], strides = [1, 1]} : vector<16x384xf32> to vector<16x128xf32>
    %28 = vector.extract_strided_slice %16 {offsets = [0, 384], sizes = [16, 128], strides = [1, 1]} : vector<16x512xf32> to vector<16x128xf32>
    %29 = math.tanh %28 : vector<16x128xf32>
    %30 = arith.mulf %26, %11 : vector<16x128xf32>
    %31 = arith.mulf %25, %29 : vector<16x128xf32>
    %32 = arith.addf %30, %31 : vector<16x128xf32>
    %33 = math.tanh %32 : vector<16x128xf32>
    %34 = arith.mulf %27, %33 : vector<16x128xf32>
    %c0_20 = arith.constant 0 : index
    %c0_21 = arith.constant 0 : index
    %35 = vector.load %arg14[%c0_20, %c0_21] : memref<16x128xf32, #tpu.memory_space<vmem>>, vector<16x128xf32>
    tpu.vector_store %arg14[%c0_20, %c0_21], %34 {strides = array<i32>} : memref<16x128xf32, #tpu.memory_space<vmem>>, vector<16x128xf32>,
    %c0_22 = arith.constant 0 : index
    %c0_23 = arith.constant 0 : index
    %36 = vector.load %arg15[%c0_22, %c0_23] : memref<16x128xf32, #tpu.memory_space<vmem>>, vector<16x128xf32>
    tpu.vector_store %arg15[%c0_22, %c0_23], %32 {strides = array<i32>} : memref<16x128xf32, #tpu.memory_space<vmem>>, vector<16x128xf32>,
    %37 = arith.truncf %34 : vector<16x128xf32> to vector<16x128xbf16>
    %c0_24 = arith.constant 0 : index
    %c0_25 = arith.constant 0 : index
    %38 = vector.load %arg7[%c0_24, %c0_25] : memref<64x128xbf16, #tpu.memory_space<vmem>>, vector<16x128xbf16>
    tpu.vector_store %arg7[%c0_24, %c0_25], %37 {strides = array<i32>} : memref<64x128xbf16, #tpu.memory_space<vmem>>, vector<16x128xbf16>,
    %c0_26 = arith.constant 0 : index
    %c0_27 = arith.constant 0 : index
    %39 = vector.load %arg14[%c0_26, %c0_27] : memref<16x128xf32, #tpu.memory_space<vmem>>, vector<16x128xf32>
    %c0_28 = arith.constant 0 : index
    %c0_29 = arith.constant 0 : index
    %40 = vector.load %arg15[%c0_28, %c0_29] : memref<16x128xf32, #tpu.memory_space<vmem>>, vector<16x128xf32>
    %c16 = arith.constant 16 : index
    %c0_30 = arith.constant 0 : index
    %41 = vector.load %arg13[%c16, %c0_30] : memref<64x512xf32, #tpu.memory_space<vmem>>, vector<16x512xf32>
    %42 = arith.truncf %39 : vector<16x128xf32> to vector<16x128xbf16>
    %c0_31 = arith.constant 0 : index
    %c0_32 = arith.constant 0 : index
    %43 = vector.load %arg11[%c0_31, %c0_32] : memref<128x512xbf16, #tpu.memory_space<vmem>>, vector<128x512xbf16>
    %cst_33 = arith.constant dense<0.000000e+00> : vector<16x512xf32>
    %44 = tpu.matmul %42, %43, %cst_33 {dimension_numbers = #tpu.dot_dimension_numbers<[1], [0], [0], [1], [0, 0, 1, 1], [], []>} : vector<16x128xbf16>, vector<128x512xbf16>, vector<16x512xf32> -> vector<16x512xf32>
    %45 = arith.addf %41, %44 : vector<16x512xf32>
    %46 = vector.extract_strided_slice %45 {offsets = [0, 0], sizes = [16, 384], strides = [1, 1]} : vector<16x512xf32> to vector<16x384xf32>
    %cst_34 = arith.constant 5.000000e-01 : f32
    %47 = vector.broadcast %cst_34 : f32 to vector<16x384xf32>
    %48 = arith.mulf %47, %46 : vector<16x384xf32>
    %49 = math.tanh %48 : vector<16x384xf32>
    %cst_35 = arith.constant 1.000000e+00 : f32
    %50 = vector.broadcast %cst_35 : f32 to vector<16x384xf32>
    %51 = arith.addf %49, %50 : vector<16x384xf32>
    %cst_36 = arith.constant 5.000000e-01 : f32
    %52 = vector.broadcast %cst_36 : f32 to vector<16x384xf32>
    %53 = arith.mulf %52, %51 : vector<16x384xf32>
    %54 = vector.extract_strided_slice %53 {offsets = [0, 0], sizes = [16, 128], strides = [1, 1]} : vector<16x384xf32> to vector<16x128xf32>
    %55 = vector.extract_strided_slice %53 {offsets = [0, 128], sizes = [16, 128], strides = [1, 1]} : vector<16x384xf32> to vector<16x128xf32>
    %56 = vector.extract_strided_slice %53 {offsets = [0, 256], sizes = [16, 128], strides = [1, 1]} : vector<16x384xf32> to vector<16x128xf32>
    %57 = vector.extract_strided_slice %45 {offsets = [0, 384], sizes = [16, 128], strides = [1, 1]} : vector<16x512xf32> to vector<16x128xf32>
    %58 = math.tanh %57 : vector<16x128xf32>
    %59 = arith.mulf %55, %40 : vector<16x128xf32>
    %60 = arith.mulf %54, %58 : vector<16x128xf32>
    %61 = arith.addf %59, %60 : vector<16x128xf32>
    %62 = math.tanh %61 : vector<16x128xf32>
    %63 = arith.mulf %56, %62 : vector<16x128xf32>
    %c0_37 = arith.constant 0 : index
    %c0_38 = arith.constant 0 : index
    %64 = vector.load %arg14[%c0_37, %c0_38] : memref<16x128xf32, #tpu.memory_space<vmem>>, vector<16x128xf32>
    tpu.vector_store %arg14[%c0_37, %c0_38], %63 {strides = array<i32>} : memref<16x128xf32, #tpu.memory_space<vmem>>, vector<16x128xf32>,
    %c0_39 = arith.constant 0 : index
    %c0_40 = arith.constant 0 : index
    %65 = vector.load %arg15[%c0_39, %c0_40] : memref<16x128xf32, #tpu.memory_space<vmem>>, vector<16x128xf32>
    tpu.vector_store %arg15[%c0_39, %c0_40], %61 {strides = array<i32>} : memref<16x128xf32, #tpu.memory_space<vmem>>, vector<16x128xf32>,
    %66 = arith.truncf %63 : vector<16x128xf32> to vector<16x128xbf16>
    %c16_41 = arith.constant 16 : index
    %c0_42 = arith.constant 0 : index
    %67 = vector.load %arg7[%c16_41, %c0_42] : memref<64x128xbf16, #tpu.memory_space<vmem>>, vector<16x128xbf16>
    tpu.vector_store %arg7[%c16_41, %c0_42], %66 {strides = array<i32>} : memref<64x128xbf16, #tpu.memory_space<vmem>>, vector<16x128xbf16>,
    %c0_43 = arith.constant 0 : index
    %c0_44 = arith.constant 0 : index
    %68 = vector.load %arg14[%c0_43, %c0_44] : memref<16x128xf32, #tpu.memory_space<vmem>>, vector<16x128xf32>
    %c0_45 = arith.constant 0 : index
    %c0_46 = arith.constant 0 : index
    %69 = vector.load %arg15[%c0_45, %c0_46] : memref<16x128xf32, #tpu.memory_space<vmem>>, vector<16x128xf32>
    %c32 = arith.constant 32 : index
    %c0_47 = arith.constant 0 : index
    %70 = vector.load %arg13[%c32, %c0_47] : memref<64x512xf32, #tpu.memory_space<vmem>>, vector<16x512xf32>
    %71 = arith.truncf %68 : vector<16x128xf32> to vector<16x128xbf16>
    %c0_48 = arith.constant 0 : index
    %c0_49 = arith.constant 0 : index
    %72 = vector.load %arg11[%c0_48, %c0_49] : memref<128x512xbf16, #tpu.memory_space<vmem>>, vector<128x512xbf16>
    %cst_50 = arith.constant dense<0.000000e+00> : vector<16x512xf32>
    %73 = tpu.matmul %71, %72, %cst_50 {dimension_numbers = #tpu.dot_dimension_numbers<[1], [0], [0], [1], [0, 0, 1, 1], [], []>} : vector<16x128xbf16>, vector<128x512xbf16>, vector<16x512xf32> -> vector<16x512xf32>
    %74 = arith.addf %70, %73 : vector<16x512xf32>
    %75 = vector.extract_strided_slice %74 {offsets = [0, 0], sizes = [16, 384], strides = [1, 1]} : vector<16x512xf32> to vector<16x384xf32>
    %cst_51 = arith.constant 5.000000e-01 : f32
    %76 = vector.broadcast %cst_51 : f32 to vector<16x384xf32>
    %77 = arith.mulf %76, %75 : vector<16x384xf32>
    %78 = math.tanh %77 : vector<16x384xf32>
    %cst_52 = arith.constant 1.000000e+00 : f32
    %79 = vector.broadcast %cst_52 : f32 to vector<16x384xf32>
    %80 = arith.addf %78, %79 : vector<16x384xf32>
    %cst_53 = arith.constant 5.000000e-01 : f32
    %81 = vector.broadcast %cst_53 : f32 to vector<16x384xf32>
    %82 = arith.mulf %81, %80 : vector<16x384xf32>
    %83 = vector.extract_strided_slice %82 {offsets = [0, 0], sizes = [16, 128], strides = [1, 1]} : vector<16x384xf32> to vector<16x128xf32>
    %84 = vector.extract_strided_slice %82 {offsets = [0, 128], sizes = [16, 128], strides = [1, 1]} : vector<16x384xf32> to vector<16x128xf32>
    %85 = vector.extract_strided_slice %82 {offsets = [0, 256], sizes = [16, 128], strides = [1, 1]} : vector<16x384xf32> to vector<16x128xf32>
    %86 = vector.extract_strided_slice %74 {offsets = [0, 384], sizes = [16, 128], strides = [1, 1]} : vector<16x512xf32> to vector<16x128xf32>
    %87 = math.tanh %86 : vector<16x128xf32>
    %88 = arith.mulf %84, %69 : vector<16x128xf32>
    %89 = arith.mulf %83, %87 : vector<16x128xf32>
    %90 = arith.addf %88, %89 : vector<16x128xf32>
    %91 = math.tanh %90 : vector<16x128xf32>
    %92 = arith.mulf %85, %91 : vector<16x128xf32>
    %c0_54 = arith.constant 0 : index
    %c0_55 = arith.constant 0 : index
    %93 = vector.load %arg14[%c0_54, %c0_55] : memref<16x128xf32, #tpu.memory_space<vmem>>, vector<16x128xf32>
    tpu.vector_store %arg14[%c0_54, %c0_55], %92 {strides = array<i32>} : memref<16x128xf32, #tpu.memory_space<vmem>>, vector<16x128xf32>,
    %c0_56 = arith.constant 0 : index
    %c0_57 = arith.constant 0 : index
    %94 = vector.load %arg15[%c0_56, %c0_57] : memref<16x128xf32, #tpu.memory_space<vmem>>, vector<16x128xf32>
    tpu.vector_store %arg15[%c0_56, %c0_57], %90 {strides = array<i32>} : memref<16x128xf32, #tpu.memory_space<vmem>>, vector<16x128xf32>,
    %95 = arith.truncf %92 : vector<16x128xf32> to vector<16x128xbf16>
    %c32_58 = arith.constant 32 : index
    %c0_59 = arith.constant 0 : index
    %96 = vector.load %arg7[%c32_58, %c0_59] : memref<64x128xbf16, #tpu.memory_space<vmem>>, vector<16x128xbf16>
    tpu.vector_store %arg7[%c32_58, %c0_59], %95 {strides = array<i32>} : memref<64x128xbf16, #tpu.memory_space<vmem>>, vector<16x128xbf16>,
    %c0_60 = arith.constant 0 : index
    %c0_61 = arith.constant 0 : index
    %97 = vector.load %arg14[%c0_60, %c0_61] : memref<16x128xf32, #tpu.memory_space<vmem>>, vector<16x128xf32>
    %c0_62 = arith.constant 0 : index
    %c0_63 = arith.constant 0 : index
    %98 = vector.load %arg15[%c0_62, %c0_63] : memref<16x128xf32, #tpu.memory_space<vmem>>, vector<16x128xf32>
    %c48 = arith.constant 48 : index
    %c0_64 = arith.constant 0 : index
    %99 = vector.load %arg13[%c48, %c0_64] : memref<64x512xf32, #tpu.memory_space<vmem>>, vector<16x512xf32>
    %100 = arith.truncf %97 : vector<16x128xf32> to vector<16x128xbf16>
    %c0_65 = arith.constant 0 : index
    %c0_66 = arith.constant 0 : index
    %101 = vector.load %arg11[%c0_65, %c0_66] : memref<128x512xbf16, #tpu.memory_space<vmem>>, vector<128x512xbf16>
    %cst_67 = arith.constant dense<0.000000e+00> : vector<16x512xf32>
    %102 = tpu.matmul %100, %101, %cst_67 {dimension_numbers = #tpu.dot_dimension_numbers<[1], [0], [0], [1], [0, 0, 1, 1], [], []>} : vector<16x128xbf16>, vector<128x512xbf16>, vector<16x512xf32> -> vector<16x512xf32>
    %103 = arith.addf %99, %102 : vector<16x512xf32>
    %104 = vector.extract_strided_slice %103 {offsets = [0, 0], sizes = [16, 384], strides = [1, 1]} : vector<16x512xf32> to vector<16x384xf32>
    %cst_68 = arith.constant 5.000000e-01 : f32
    %105 = vector.broadcast %cst_68 : f32 to vector<16x384xf32>
    %106 = arith.mulf %105, %104 : vector<16x384xf32>
    %107 = math.tanh %106 : vector<16x384xf32>
    %cst_69 = arith.constant 1.000000e+00 : f32
    %108 = vector.broadcast %cst_69 : f32 to vector<16x384xf32>
    %109 = arith.addf %107, %108 : vector<16x384xf32>
    %cst_70 = arith.constant 5.000000e-01 : f32
    %110 = vector.broadcast %cst_70 : f32 to vector<16x384xf32>
    %111 = arith.mulf %110, %109 : vector<16x384xf32>
    %112 = vector.extract_strided_slice %111 {offsets = [0, 0], sizes = [16, 128], strides = [1, 1]} : vector<16x384xf32> to vector<16x128xf32>
    %113 = vector.extract_strided_slice %111 {offsets = [0, 128], sizes = [16, 128], strides = [1, 1]} : vector<16x384xf32> to vector<16x128xf32>
    %114 = vector.extract_strided_slice %111 {offsets = [0, 256], sizes = [16, 128], strides = [1, 1]} : vector<16x384xf32> to vector<16x128xf32>
    %115 = vector.extract_strided_slice %103 {offsets = [0, 384], sizes = [16, 128], strides = [1, 1]} : vector<16x512xf32> to vector<16x128xf32>
    %116 = math.tanh %115 : vector<16x128xf32>
    %117 = arith.mulf %113, %98 : vector<16x128xf32>
    %118 = arith.mulf %112, %116 : vector<16x128xf32>
    %119 = arith.addf %117, %118 : vector<16x128xf32>
    %120 = math.tanh %119 : vector<16x128xf32>
    %121 = arith.mulf %114, %120 : vector<16x128xf32>
    %c0_71 = arith.constant 0 : index
    %c0_72 = arith.constant 0 : index
    %122 = vector.load %arg14[%c0_71, %c0_72] : memref<16x128xf32, #tpu.memory_space<vmem>>, vector<16x128xf32>
    tpu.vector_store %arg14[%c0_71, %c0_72], %121 {strides = array<i32>} : memref<16x128xf32, #tpu.memory_space<vmem>>, vector<16x128xf32>,
    %c0_73 = arith.constant 0 : index
    %c0_74 = arith.constant 0 : index
    %123 = vector.load %arg15[%c0_73, %c0_74] : memref<16x128xf32, #tpu.memory_space<vmem>>, vector<16x128xf32>
    tpu.vector_store %arg15[%c0_73, %c0_74], %119 {strides = array<i32>} : memref<16x128xf32, #tpu.memory_space<vmem>>, vector<16x128xf32>,
    %124 = arith.truncf %121 : vector<16x128xf32> to vector<16x128xbf16>
    %c48_75 = arith.constant 48 : index
    %c0_76 = arith.constant 0 : index
    %125 = vector.load %arg7[%c48_75, %c0_76] : memref<64x128xbf16, #tpu.memory_space<vmem>>, vector<16x128xbf16>
    tpu.vector_store %arg7[%c48_75, %c0_76], %124 {strides = array<i32>} : memref<64x128xbf16, #tpu.memory_space<vmem>>, vector<16x128xbf16>,
    %c1_i32 = arith.constant 1 : i32
    %126 = arith.cmpi eq, %arg0, %c1_i32 : i32
    %127 = arith.extui %126 : i1 to i32
    %c0_i32_77 = arith.constant 0 : i32
    %128 = arith.cmpi ne, %127, %c0_i32_77 : i32
    scf.if %128 {
      %c0_78 = arith.constant 0 : index
      %c0_79 = arith.constant 0 : index
      %129 = vector.load %arg14[%c0_78, %c0_79] : memref<16x128xf32, #tpu.memory_space<vmem>>, vector<16x128xf32>
      %c0_80 = arith.constant 0 : index
      %c0_81 = arith.constant 0 : index
      %130 = vector.load %arg8[%c0_80, %c0_81] : memref<16x128xf32, #tpu.memory_space<vmem>>, vector<16x128xf32>
      tpu.vector_store %arg8[%c0_80, %c0_81], %129 {strides = array<i32>} : memref<16x128xf32, #tpu.memory_space<vmem>>, vector<16x128xf32>,
      %c0_82 = arith.constant 0 : index
      %c0_83 = arith.constant 0 : index
      %131 = vector.load %arg15[%c0_82, %c0_83] : memref<16x128xf32, #tpu.memory_space<vmem>>, vector<16x128xf32>
      %c0_84 = arith.constant 0 : index
      %c0_85 = arith.constant 0 : index
      %132 = vector.load %arg9[%c0_84, %c0_85] : memref<16x128xf32, #tpu.memory_space<vmem>>, vector<16x128xf32>
      tpu.vector_store %arg9[%c0_84, %c0_85], %131 {strides = array<i32>} : memref<16x128xf32, #tpu.memory_space<vmem>>, vector<16x128xf32>,
    } else {
    }
    return
  }
  func.func @transform_0(%arg0: i32) -> (i32, i32) {
    %c0_i32 = arith.constant 0 : i32
    %c0_i32_0 = arith.constant 0 : i32
    return %arg0, %c0_i32 : i32, i32
  }
  func.func @transform_3(%arg0: i32) -> (i32, i32) {
    %c0_i32 = arith.constant 0 : i32
    %c0_i32_0 = arith.constant 0 : i32
    %c0_i32_1 = arith.constant 0 : i32
    return %c0_i32, %c0_i32_0 : i32, i32
  }
  func.func @transform_4(%arg0: i32) -> (i32, i32) {
    %c0_i32 = arith.constant 0 : i32
    %c0_i32_0 = arith.constant 0 : i32
    %c0_i32_1 = arith.constant 0 : i32
    return %c0_i32, %c0_i32_0 : i32, i32
  }
  func.func @transform_5(%arg0: i32) -> (i32, i32) {
    %c0_i32 = arith.constant 0 : i32
    %c0_i32_0 = arith.constant 0 : i32
    %c0_i32_1 = arith.constant 0 : i32
    return %c0_i32, %c0_i32_0 : i32, i32
  }
  func.func @transform_6(%arg0: i32) -> (i32, i32) {
    %c0_i32 = arith.constant 0 : i32
    %c0_i32_0 = arith.constant 0 : i32
    return %arg0, %c0_i32 : i32, i32
  }
  func.func @transform_7(%arg0: i32) -> (i32, i32) {
    %c0_i32 = arith.constant 0 : i32
    %c0_i32_0 = arith.constant 0 : i32
    %c0_i32_1 = arith.constant 0 : i32
    return %c0_i32, %c0_i32_0 : i32, i32
  }
  func.func @transform_8(%arg0: i32) -> (i32, i32) {
    %c0_i32 = arith.constant 0 : i32
    %c0_i32_0 = arith.constant 0 : i32
    %c0_i32_1 = arith.constant 0 : i32
    return %c0_i32, %c0_i32_0 : i32, i32
  }
}

</mosaic_0001>

<bundles_post_ra>
// kernel: tpu_custom_call.1
= control target key start
LH: loop header
LB: loop body
LE: loop exit
PB: predicated region body
PF: predicated region fallthrough
CT: control target
= control target key end

     0   :  { %s3287_s0 = inlined_call_operand.vmem [shape: bf16[128,16], index: 0, kind: input, shape index: {}]   ;;  %s3288_s1 = inlined_call_operand.vmem [shape: bf16[16,512], index: 1, kind: input, shape index: {}]   ;;  %s3289_s2 = inlined_call_operand.hbm [shape: bf16[128,512], index: 2, kind: input, shape index: {}]   ;;  %s3290_s3 = inlined_call_operand.vmem [shape: f32[1,512], index: 3, kind: input, shape index: {}]   ;;  %s3291_s4 = inlined_call_operand.vmem [shape: f32[16,128], index: 4, kind: input, shape index: {}]   ;;  %s3292_s5 = inlined_call_operand.vmem [shape: f32[16,128], index: 5, kind: input, shape index: {}]   ;;  %s3293_s6 = inlined_call_operand.hbm [shape: bf16[128,128], index: 6, kind: output, shape index: {0}]   ;;  %s3294_s7 = inlined_call_operand.hbm [shape: f32[16,128], index: 7, kind: output, shape index: {1}]   ;;  %s3295_s8 = inlined_call_operand.hbm [shape: f32[16,128], index: 8, kind: output, shape index: {2}]  }
   0x1   :  { %3298 = sst [smem:[#allocation41_spill]] %s3287_s0 }
   0x2   :  { %14 = vsyncpa [#allocation9], 0 }
   0x3   :  { %16 = vsyncpa [#allocation9 + $0x1], 0 }
   0x4   :  { %17 = vsyncpa [#allocation11], 0  ;;  %s2791_s27 = smov 0   ;;  %s2793_s28 = smov 0  }
   0x5   :  { %s2795_s29 = smov 0   ;;  %s2797_s30 = smov 0  }
   0x6 LB: > { %s2812_s9 = sadd.s32 4294967295, %s2735_s30   ;;  %s2150_s10 = sadd.s32 4294967294, %s2735_s30   ;;  %s2735_s30 = sphi %s2797_s30, %s3344_s30   ;;  %s2731_s29 = sphi %s2795_s29, %s3343_s29   ;;  %s2727_s28 = sphi %s2793_s28, %s3342_s28   ;;  %s2723_s27 = sphi %s2791_s27, %s3341_s27  }
   0x7   : > { %s2816_s11 = sadd.s32 1, %s2735_s30   ;;  %s119_s12 = sadd.s32 1, %s2731_s29 }
   0x8   : > { %s116_s13 = ssub.s32 %s2735_s30, %s2816_s11  ;;  %p129_p0 = scmp.ne.s32.totalorder %s2731_s29, %s2727_s28 }
   0x9   : > { %p117_p1 = scmp.eq.s32.totalorder %s116_s13, 0  ;;  %p130_p2 = scmp.eq.s32.totalorder %s2812_s9, 1 }
   0xa   : > { %p135_p3 = scmp.ne.s32.totalorder %s2727_s28, %s2723_s27  ;;  %p136_p4 = scmp.eq.s32.totalorder %s2150_s10, 1 }
   0xb   : > { %s2827_s14 = scalar_select %p117_p1, %s2731_s29, %s119_s12  }
   0xc   : > { %p2831_p5 = por %p130_p2, %p129_p0  ;;  %p2835_p6 = por %p136_p4, %p135_p3 }
   0xd   : > { %p2153_p7 = scmp.ge.s32.totalorder %s2735_s30, 1  ;;  %p214_p8 = scmp.lt.s32.totalorder %s2735_s30, 3 }
   0xf   : > { %p215_p9 = pnand %p2153_p7, %p214_p8 }
  0x11   : > { %218 = sbr.rel (%p215_p9) target bundleno = 1120 (0x460), region = 36 }
  0x16   : > { %s237_s17 = sand.u32 1, %s2727_s28   ;;  %s2155_s18 = sshll.u32 %s2812_s9, 3 }
  0x17   : > { %s2154_s19 = sshll.u32 %s237_s17, 5  ;;  %p245_p10 = scmp.lt.s32.totalorder %s2155_s18, 15 }
  0x18   : > { %s3301_s0 = sld [smem:[#allocation41_spill]]  ;;  %s2850_s24 = scalar_lea.vmem [#allocation8], %s2154_s19 }
  0x19   : > { %s3346_s18 = smov (!%p245_p10, %s2155_s18), 15  ;;  %p2157_p11 = scmp.ne.s32.totalorder %s2812_s9, 0 }
  0x1a   : > { %s2156_s20 = sshll.u32 %s3346_s18, 2 }
  0x1b   : > { %255 = sbr.rel (%p2157_p11) target bundleno = 50 (0x32), region = 40 }
  0x1e   : > { %s2848_s23 = scalar_lea.vmem %s3301_s0, %s2156_s20 }
  0x20   : > { %v289_v0 = vld [vmem:[%s3288_s1] sm:$0xff]  ;;  %v291_v1 = vld [vmem:[%s3288_s1 + $0x8] sm:$0xff]  ;;  %v293_v2 = vld [vmem:[%s3288_s1 + $0x10] sm:$0xff] }
  0x21   : > { %290 = vst [vmem:[#allocation2 + $0x10] sm:$0xff] %v289_v0  ;;  %292 = vst [vmem:[#allocation2] sm:$0xff] %v291_v1  ;;  %v295_v3 = vld [vmem:[%s3288_s1 + $0x18] sm:$0xff] }
  0x22   : > { %294 = vst [vmem:[#allocation2 + $0x18] sm:$0xff] %v293_v2  ;;  %296 = vst [vmem:[#allocation2 + $0x8] sm:$0xff] %v295_v3 }
  0x23   : > { %304 = vsyncadd [#allocation4], 512  ;;  %v317_v4 = vld [vmem:[%s3291_s4] sm:$0xff]  ;;  %v318_v5 = vld [vmem:[%s3291_s4 + $0x8] sm:$0xff]  ;;  %s2737_s10 = smov [#allocation3]  }
  0x24   : > { %s313_s12 = sshll.u32 %s2737_s10, 4  ;;  %319 = vst [vmem:[#allocation6] sm:$0xff] %v317_v4  ;;  %320 = vst [vmem:[#allocation6 + $0x8] sm:$0xff] %v318_v5  ;;  %v321_v6 = vld [vmem:[%s3292_s5] sm:$0xff]  ;;  %v322_v7 = vld [vmem:[%s3292_s5 + $0x8] sm:$0xff]  ;;  %s314_s12 = int_to_ptr.vmem [resolvable:$true] %s313_s12 }
  0x25   : > { %323 = vst [vmem:[#allocation7] sm:$0xff] %v321_v6  ;;  %324 = vst [vmem:[#allocation7 + $0x8] sm:$0xff] %v322_v7  ;;  %s2607_s21 = scalar_lea.vmem %s314_s12, 4096  ;;  %p2612_p13 = scmp.lt.s32.totalorder %s314_s12, %s314_s12 }
  0x26   : > { %p2608_p12 = scmp.ne.s32.totalorder %s314_s12, %s2607_s21  ;;  %p2613_p0 = scmp.lt.s32.totalorder %s2607_s21, %s2607_s21 }
  0x28   : > { %p2614_p1 = por %p2613_p0, %p2612_p13 }
  0x2a   : > { %p2615_p3 = pnand %p2614_p1, %p2608_p12 }
  0x2c   : > { %2618 = shalt.err (!%p2615_p3)  }
  0x2d   : > { %316 = dma.hbm_to_vmem [thread:$0]  %s3289_s2, 4096, %s314_s12, [#allocation4 + $0x1] }
  0x2e   : > { %2709 = dma.done.wait [#allocation4], 512 }
  0x2f   : > { %2710 = vsyncadd [#allocation4], 4294966784 }
  0x30   : > { %2711 = dma.done.wait [#allocation4 + $0x1], 4096 }
  0x31   : > { %2712 = vsyncadd [#allocation4 + $0x1], 4294963200 }
  0x32 PF: > { %v2413_v8 = vld [vmem:[#allocation2 + $0x14] ss:$8 sps:$4 sm:$0xff]   ;;  %v2415_v9 = vld [vmem:[#allocation2 + $0x4] ss:$8 sps:$4 sm:$0xff]   ;;  %v3296_v10 = vmov 0   ;;  %vm407_vm0 = vcmask 130048   ;;  %v347_v52 = vlaneseq }
  0x33   : > { %452 = vmatprep.mubr.bf16.mxu0 %v3296_v10  ;;  %525 = vmatprep.mubr.bf16.mxu1 %v3296_v10  ;;  %v2417_v11 = vld [vmem:[#allocation2 + $0x10] ss:$8 sps:$4 sm:$0xff]   ;;  %v2418_v12 = vld [vmem:[#allocation2] ss:$8 sps:$4 sm:$0xff]   ;;  %v2885_v15 = vld [vmem:[#allocation3 + $0xe4] ss:$16 sps:$4 sm:$0xff]  }
  0x34   : > { %434 = vmatprep.subr.bf16.mxu0 %v2413_v8  ;;  %507 = vmatprep.subr.bf16.mxu1 %v2415_v9  ;;  %v2419_v13 = vld [vmem:[%s2848_s23] sm:$0xff]   ;;  %v2887_v16 = vld [vmem:[#allocation3 + $0xe8] ss:$16 sps:$4 sm:$0xff]   ;;  %v2890_v17 = vld [vmem:[#allocation3 + $0xec] ss:$16 sps:$4 sm:$0xff]   ;;  %v348_v53 = vshrl.u32 %v347_v52, 7 }
  0x35   : > { %435 = vmatpush1.bf16.msra.mxu0 %v2417_v11  ;;  %508 = vmatpush1.bf16.msra.mxu1 %v2418_v12  ;;  %v2883_v14 = vld [vmem:[#allocation3 + $0xe0] ss:$16 sps:$4 sm:$0xff]   ;;  %v2894_v18 = vld [vmem:[#allocation3 + $0xc4] ss:$16 sps:$4 sm:$0xff]   ;;  %v2900_v20 = vld [vmem:[#allocation3 + $0xcc] ss:$16 sps:$4 sm:$0xff]  }
  0x36   : > { %803 = vmatprep.subr.bf16.mxu0 %v2885_v15  ;;  %846 = vmatprep.subr.bf16.mxu1 %v2890_v17  ;;  %v2898_v19 = vld [vmem:[#allocation3 + $0xc0] ss:$16 sps:$4 sm:$0xff]   ;;  %v2904_v21 = vld [vmem:[#allocation3 + $0xc8] ss:$16 sps:$4 sm:$0xff]   ;;  %v2910_v23 = vld [vmem:[#allocation3 + $0xa4] ss:$16 sps:$4 sm:$0xff]  }
  0x37   : > { %v2432_v22 = vld [vmem:[%s2848_s23 + $0x8] sm:$0xff]   ;;  %v2913_v24 = vld [vmem:[#allocation3 + $0xa0] ss:$16 sps:$4 sm:$0xff]   ;;  %v2921_v27 = vld [vmem:[#allocation3 + $0x84] ss:$16 sps:$4 sm:$0xff]   ;;  %v349_v58 = vsub.s32 0, %v348_v53 }
  0x38   : > { %2166 = vmatmul.mubr.msk.bf16.vlgmr.msra.gmra.mxu0 %vm407_vm0, %v2419_v13  ;;  %2170 = vmatmul.mubr.msk.bf16.vlgmr.msra.gmra.mxu1 %vm407_vm0, %v2419_v13  ;;  %v2915_v25 = vld [vmem:[#allocation3 + $0xac] ss:$16 sps:$4 sm:$0xff]   ;;  %v2919_v26 = vld [vmem:[#allocation3 + $0xa8] ss:$16 sps:$4 sm:$0xff]   ;;  %v2929_v29 = vld [vmem:[#allocation3 + $0x80] ss:$16 sps:$4 sm:$0xff]  }
  0x39   : > { %804 = vmatpush1.bf16.msra.mxu0 %v2883_v14  ;;  %847 = vmatpush1.bf16.msra.mxu1 %v2887_v16  ;;  %v2926_v28 = vld [vmem:[#allocation3 + $0x8c] ss:$16 sps:$4 sm:$0xff]   ;;  %v2934_v30 = vld [vmem:[#allocation3 + $0x88] ss:$16 sps:$4 sm:$0xff]   ;;  %v2936_v31 = vld [vmem:[#allocation3 + $0x64] ss:$16 sps:$4 sm:$0xff]  }
  0x3a   : > { %805 = vmatprep.subr.bf16.mxu0 %v2894_v18  ;;  %848 = vmatprep.subr.bf16.mxu1 %v2900_v20  ;;  %v2940_v32 = vld [vmem:[#allocation3 + $0x6c] ss:$16 sps:$4 sm:$0xff]   ;;  %v2445_v33 = vld [vmem:[%s2848_s23 + $0x10] sm:$0xff]   ;;  %v2948_v35 = vld [vmem:[#allocation3 + $0x68] ss:$16 sps:$4 sm:$0xff]   ;;  %v357_v59 = vsub.s32 2, %v348_v53 }
  0x3b   : > { %462 = vmatprep.mubr.bf16.mxu0 %v3296_v10  ;;  %535 = vmatprep.mubr.bf16.mxu1 %v3296_v10  ;;  %v2944_v34 = vld [vmem:[#allocation3 + $0x60] ss:$16 sps:$4 sm:$0xff]   ;;  %v2950_v36 = vld [vmem:[#allocation3 + $0x44] ss:$16 sps:$4 sm:$0xff]   ;;  %v2953_v37 = vld [vmem:[#allocation3 + $0x4c] ss:$16 sps:$4 sm:$0xff]  }
  0x3c   : > { %v2957_v38 = vld [vmem:[#allocation3 + $0x40] ss:$16 sps:$4 sm:$0xff]   ;;  %v2960_v39 = vld [vmem:[#allocation3 + $0x48] ss:$16 sps:$4 sm:$0xff]   ;;  %v2965_v40 = vld [vmem:[#allocation3 + $0x24] ss:$16 sps:$4 sm:$0xff]  }
  0x3d   : > { %806 = vmatpush1.bf16.msra.mxu0 %v2898_v19  ;;  %849 = vmatpush1.bf16.msra.mxu1 %v2904_v21  ;;  %v2969_v41 = vld [vmem:[#allocation3 + $0x2c] ss:$16 sps:$4 sm:$0xff]   ;;  %v2972_v43 = vld [vmem:[#allocation3 + $0x20] ss:$16 sps:$4 sm:$0xff]   ;;  %v2975_v44 = vld [vmem:[#allocation3 + $0x28] ss:$16 sps:$4 sm:$0xff]  }
  0x3e   : > { %807 = vmatprep.subr.bf16.mxu0 %v2910_v23  ;;  %850 = vmatprep.subr.bf16.mxu1 %v2915_v25  ;;  %v2458_v42 = vld [vmem:[%s2848_s23 + $0x18] sm:$0xff]   ;;  %v2977_v45 = vld [vmem:[#allocation3 + $0x4] ss:$16 sps:$4 sm:$0xff]   ;;  %v2984_v47 = vld [vmem:[#allocation3] ss:$16 sps:$4 sm:$0xff]   ;;  %v353_v63 = vsub.s32 1, %v348_v53 }
  0x3f   : > { %v2979_v46 = vld [vmem:[#allocation3 + $0xc] ss:$16 sps:$4 sm:$0xff]   ;;  %v598_v48 = vld [vmem:[#allocation6] sm:$0xff]  ;;  %v2988_v50 = vld [vmem:[#allocation3 + $0x8] ss:$16 sps:$4 sm:$0xff]   ;;  %v361_v0 = vsub.s32 3, %v348_v53 }
  0x40   : > { %2167 = vmatmul.mubr.msk.bf16.gmra.mxu0 %vm407_vm0, %v2432_v22  ;;  %2171 = vmatmul.mubr.msk.bf16.gmra.mxu1 %vm407_vm0, %v2432_v22  ;;  %v599_v49 = vld [vmem:[#allocation6 + $0x8] sm:$0xff]  ;;  %v345_v60 = vld [vmem:[%s3290_s3] sm:$0xf]  ;;  %p2310_p4 = scmp.ne.s32.totalorder %s2812_s9, 1 }
  0x41   : > { %808 = vmatpush1.bf16.msra.mxu0 %v2913_v24  ;;  %472 = vmatprep.mubr.bf16.mxu0 %v3296_v10  ;;  %v610_v51 = vpack.c.bf16 %v599_v49, %v598_v48  ;;  %v350_v3 = vrot.slane %v345_v60, %v349_v58  ;;  %v3053_v4 = vrot.slane %v345_v60, %v357_v59 }
  0x42   : > { %851 = vmatpush1.bf16.msra.mxu1 %v2919_v26  ;;  %809 = vmatprep.subr.bf16.mxu0 %v2921_v27  ;;  %v354_v7 = vrot.slane %v345_v60, %v353_v63  ;;  %v3055_v8 = vrot.slane %v345_v60, %v361_v0 }
  0x43   : > { %852 = vmatprep.subr.bf16.mxu1 %v2926_v28  ;;  %545 = vmatprep.mubr.bf16.mxu1 %v3296_v10 }
  0x45   : > { %810 = vmatpush1.bf16.msra.mxu0 %v2929_v29 }
  0x46   : > { %853 = vmatpush1.bf16.msra.mxu1 %v2934_v30  ;;  %811 = vmatprep.subr.bf16.mxu0 %v2936_v31 }
  0x47   : > { %854 = vmatprep.subr.bf16.mxu1 %v2940_v32 }
  0x48   : > { %2168 = vmatmul.mubr.msk.bf16.gmra.mxu0 %vm407_vm0, %v2445_v33  ;;  %2172 = vmatmul.mubr.msk.bf16.gmra.mxu1 %vm407_vm0, %v2445_v33 }
  0x49   : > { %812 = vmatpush1.bf16.msra.mxu0 %v2944_v34  ;;  %482 = vmatprep.mubr.bf16.mxu0 %v3296_v10 }
  0x4a   : > { %855 = vmatpush1.bf16.msra.mxu1 %v2948_v35  ;;  %813 = vmatprep.subr.bf16.mxu0 %v2950_v36 }
  0x4b   : > { %856 = vmatprep.subr.bf16.mxu1 %v2953_v37  ;;  %555 = vmatprep.mubr.bf16.mxu1 %v3296_v10 }
  0x4d   : > { %814 = vmatpush1.bf16.msra.mxu0 %v2957_v38 }
  0x4e   : > { %857 = vmatpush1.bf16.msra.mxu1 %v2960_v39  ;;  %815 = vmatprep.subr.bf16.mxu0 %v2965_v40 }
  0x4f   : > { %858 = vmatprep.subr.bf16.mxu1 %v2969_v41 }
  0x50   : > { %2169 = vmatmul.mubr.msk.bf16.gmra.mxu0 %vm407_vm0, %v2458_v42  ;;  %2173 = vmatmul.mubr.msk.bf16.gmra.mxu1 %vm407_vm0, %v2458_v42 }
  0x51   : > { %816 = vmatpush1.bf16.msra.mxu0 %v2972_v43  ;;  %835 = vmatprep.mubr.bf16.mxu0 %v3296_v10 }
  0x52   : > { %859 = vmatpush1.bf16.msra.mxu1 %v2975_v44  ;;  %817 = vmatprep.subr.bf16.mxu0 %v2977_v45 }
  0x53   : > { %860 = vmatprep.subr.bf16.mxu1 %v2979_v46  ;;  %878 = vmatprep.mubr.bf16.mxu1 %v3296_v10 }
  0x55   : > { %818 = vmatpush1.bf16.msra.mxu0 %v2984_v47 }
  0x56   : > { %861 = vmatpush1.bf16.msra.mxu1 %v2988_v50  ;;  %1152 = vmatprep.subr.bf16.mxu0 %v2885_v15 }
  0x57   : > { %1195 = vmatprep.subr.bf16.mxu1 %v2890_v17 }
  0x58   : > { %836 = vmatmul.mubr.bf16.vlgmr.msra.gmra.mxu0 %v610_v51 }
  0x59   : > { %879 = vmatmul.mubr.bf16.vlgmr.msra.gmra.mxu1 %v610_v51  ;;  %1153 = vmatpush1.bf16.msra.mxu0 %v2883_v14 }
  0x5a   : > { %1196 = vmatpush1.bf16.msra.mxu1 %v2887_v16  ;;  %1154 = vmatprep.subr.bf16.mxu0 %v2894_v18 }
  0x5b   : > { %1197 = vmatprep.subr.bf16.mxu1 %v2900_v20  ;;  %1184 = vmatprep.mubr.bf16.mxu0 %v3296_v10 }
  0x5c   : > { %1227 = vmatprep.mubr.bf16.mxu1 %v3296_v10 }
  0x5d   : > { %1155 = vmatpush1.bf16.msra.mxu0 %v2898_v19 }
  0x5e   : > { %1198 = vmatpush1.bf16.msra.mxu1 %v2904_v21  ;;  %1156 = vmatprep.subr.bf16.mxu0 %v2910_v23 }
  0x5f   : > { %1199 = vmatprep.subr.bf16.mxu1 %v2915_v25 }
  0x61   : > { %1157 = vmatpush1.bf16.msra.mxu0 %v2913_v24 }
  0x62   : > { %1200 = vmatpush1.bf16.msra.mxu1 %v2919_v26  ;;  %1158 = vmatprep.subr.bf16.mxu0 %v2921_v27 }
  0x63   : > { %1201 = vmatprep.subr.bf16.mxu1 %v2926_v28 }
  0x65   : > { %1159 = vmatpush1.bf16.msra.mxu0 %v2929_v29 }
  0x66   : > { %1202 = vmatpush1.bf16.msra.mxu1 %v2934_v30  ;;  %1160 = vmatprep.subr.bf16.mxu0 %v2936_v31 }
  0x67   : > { %1203 = vmatprep.subr.bf16.mxu1 %v2940_v32 }
  0x69   : > { %1161 = vmatpush1.bf16.msra.mxu0 %v2944_v34 }
  0x6a   : > { %1204 = vmatpush1.bf16.msra.mxu1 %v2948_v35  ;;  %1162 = vmatprep.subr.bf16.mxu0 %v2950_v36 }
  0x6b   : > { %1205 = vmatprep.subr.bf16.mxu1 %v2953_v37 }
  0x6d   : > { %1163 = vmatpush1.bf16.msra.mxu0 %v2957_v38 }
  0x6e   : > { %1206 = vmatpush1.bf16.msra.mxu1 %v2960_v39  ;;  %1164 = vmatprep.subr.bf16.mxu0 %v2965_v40 }
  0x6f   : > { %1207 = vmatprep.subr.bf16.mxu1 %v2969_v41 }
  0x71   : > { %1165 = vmatpush1.bf16.msra.mxu0 %v2972_v43 }
  0x72   : > { %1208 = vmatpush1.bf16.msra.mxu1 %v2975_v44  ;;  %1166 = vmatprep.subr.bf16.mxu0 %v2977_v45 }
  0x73   : > { %1209 = vmatprep.subr.bf16.mxu1 %v2979_v46 }
  0x75   : > { %1167 = vmatpush1.bf16.msra.mxu0 %v2984_v47 }
  0x76   : > { %1210 = vmatpush1.bf16.msra.mxu1 %v2988_v50  ;;  %1501 = vmatprep.subr.bf16.mxu0 %v2885_v15 }
  0x77   : > { %1544 = vmatprep.subr.bf16.mxu1 %v2890_v17 }
  0xf8   : > { %v3034_v54 = vpop.f32.mrf.mxu0  ;;  %v3036_v55 = vpop.f32.mrf.mxu1 }
  0xfa   : > { %v3038_v56 = vpop.f32.mrf.mxu0  ;;  %v3040_v57 = vpop.f32.mrf.mxu1 }
  0xfc   : > { %v3045_v61 = vpop.f32.mrf.mxu0  ;;  %v3047_v62 = vpop.f32.mrf.mxu1 }
  0xfe   : > { %v3049_v1 = vpop.f32.mrf.mxu0  ;;  %v3051_v2 = vpop.f32.mrf.mxu1 }
 0x100   : > { %v464_v5 = vpop.f32.mrf.mxu0  ;;  %v537_v6 = vpop.f32.mrf.mxu1 }
 0x101   : > { %v3057_v9 = vadd.f32 %v464_v5, %v350_v3  ;;  %v3060_v11 = vadd.f32 %v537_v6, %v3053_v4 }
 0x102   : > { %v466_v12 = vpop.f32.mrf.mxu0  ;;  %v539_v13 = vpop.f32.mrf.mxu1 }
 0x103   : > { %3302 = vst [vmem:[#allocation22_spill] sm:$0xff] %v3060_v11  ;;  %v3062_v15 = vadd.f32 %v466_v12, %v354_v7  ;;  %v3065_v17 = vadd.f32 %v539_v13, %v3055_v8 }
 0x104   : > { %v468_v22 = vpop.f32.mrf.mxu0  ;;  %v541_v33 = vpop.f32.mrf.mxu1 }
 0x105   : > { %v3067_v42 = vadd.f32 %v468_v22, %v350_v3  ;;  %v3070_v48 = vadd.f32 %v541_v33, %v3053_v4 }
 0x106   : > { %v470_v49 = vpop.f32.mrf.mxu0  ;;  %v543_v51 = vpop.f32.mrf.mxu1 }
 0x107   : > { %3303 = vst [vmem:[#allocation23_spill] sm:$0xff] %v3070_v48  ;;  %v3072_v52 = vadd.f32 %v470_v49, %v354_v7  ;;  %v3075_v53 = vadd.f32 %v543_v51, %v3055_v8  ;;  %v530_v48 = vadd.f32 %v3040_v57, %v3055_v8 }
 0x108   : > { %v474_v58 = vpop.f32.mrf.mxu0  ;;  %v547_v59 = vpop.f32.mrf.mxu1 }
 0x109   : > { %3304 = vst [vmem:[#allocation24_spill] sm:$0xff] %v3075_v53  ;;  %v3077_v60 = vadd.f32 %v474_v58, %v350_v3  ;;  %v3080_v63 = vadd.f32 %v547_v59, %v3053_v4 }
 0x10a   : > { %v476_v0 = vpop.f32.mrf.mxu0  ;;  %v549_v5 = vpop.f32.mrf.mxu1 }
 0x10b   : > { %3305 = vst [vmem:[#allocation25_spill] sm:$0xff] %v3077_v60  ;;  %3306 = vst [vmem:[#allocation26_spill] sm:$0xff] %v3080_v63  ;;  %v3082_v6 = vadd.f32 %v476_v0, %v354_v7  ;;  %v3085_v12 = vadd.f32 %v549_v5, %v3055_v8 }
 0x10c   : > { %v478_v13 = vpop.f32.mrf.mxu0  ;;  %v551_v22 = vpop.f32.mrf.mxu1 }
 0x10d   : > { %3307 = vst [vmem:[#allocation27_spill] sm:$0xff] %v3082_v6  ;;  %3308 = vst [vmem:[#allocation28_spill] sm:$0xff] %v3085_v12  ;;  %v3087_v33 = vadd.f32 %v478_v13, %v350_v3  ;;  %v3090_v49 = vadd.f32 %v551_v22, %v3053_v4 }
 0x10e   : > { %v480_v51 = vpop.f32.mrf.mxu0  ;;  %v553_v58 = vpop.f32.mrf.mxu1 }
 0x10f   : > { %3309 = vst [vmem:[#allocation29_spill] sm:$0xff] %v3087_v33  ;;  %3310 = vst [vmem:[#allocation30_spill] sm:$0xff] %v3090_v49  ;;  %v3092_v10 = vadd.f32 %v480_v51, %v354_v7  ;;  %v3095_v59 = vadd.f32 %v553_v58, %v3055_v8 }
 0x110   : > { %v484_v63 = vpop.f32.mrf.mxu0  ;;  %v557_v0 = vpop.f32.mrf.mxu1 }
 0x111   : > { %3311 = vst [vmem:[#allocation31_spill] sm:$0xff] %v3092_v10  ;;  %3312 = vst [vmem:[#allocation32_spill] sm:$0xff] %v3095_v59  ;;  %v3097_v6 = vadd.f32 %v484_v63, %v350_v3  ;;  %v3100_v5 = vadd.f32 %v557_v0, %v3053_v4 }
 0x112   : > { %v486_v12 = vpop.f32.mrf.mxu0  ;;  %v559_v13 = vpop.f32.mrf.mxu1 }
 0x113   : > { %3313 = vst [vmem:[#allocation33_spill] sm:$0xff] %v3097_v6  ;;  %3314 = vst [vmem:[#allocation34_spill] sm:$0xff] %v3100_v5  ;;  %v3102_v33 = vadd.f32 %v486_v12, %v354_v7  ;;  %v3105_v22 = vadd.f32 %v559_v13, %v3055_v8  ;;  %v455_v6 = vadd.f32 %v3034_v54, %v350_v3 }
 0x114   : > { %v488_v49 = vpop.f32.mrf.mxu0  ;;  %v561_v51 = vpop.f32.mrf.mxu1  ;;  %v457_v13 = vadd.f32 %v3038_v56, %v354_v7 }
 0x115   : > { %3315 = vst [vmem:[#allocation35_spill] sm:$0xff] %v3102_v33  ;;  %3316 = vst [vmem:[#allocation36_spill] sm:$0xff] %v3105_v22  ;;  %v3107_v10 = vadd.f32 %v488_v49, %v350_v3  ;;  %v3110_v58 = vadd.f32 %v561_v51, %v3053_v4  ;;  %v459_v49 = vadd.f32 %v3045_v61, %v350_v3 }
 0x116   : > { %v490_v59 = vpop.f32.mrf.mxu0  ;;  %v563_v63 = vpop.f32.mrf.mxu1  ;;  %v534_v61 = vadd.f32 %v3051_v2, %v3055_v8 }
 0x117   : > { %3317 = vst [vmem:[#allocation37_spill] sm:$0xff] %v3107_v10  ;;  %3318 = vst [vmem:[#allocation38_spill] sm:$0xff] %v3110_v58  ;;  %v3113_v0 = vadd.f32 %v490_v59, %v354_v7  ;;  %v3116_v5 = vadd.f32 %v563_v63, %v3055_v8  ;;  %v461_v59 = vadd.f32 %v3049_v1, %v354_v7 }
 0x118   : > { %v837_v12 = vpop.f32.mrf.mxu0  ;;  %v532_v1 = vadd.f32 %v3047_v62, %v3053_v4 }
 0x119   : > { %3319 = vst [vmem:[#allocation39_spill] sm:$0xff] %v3113_v0  ;;  %3320 = vst [vmem:[#allocation40_spill] sm:$0xff] %v3116_v5  ;;  %v889_v22 = vadd.f32 %v837_v12, %v455_v6  ;;  %v880_v33 = vpop.f32.mrf.mxu1 }
 0x11a   : > { %v839_v60 = vpop.f32.mrf.mxu0 }
 0x11b   : > { %v897_v10 = vmul.f32 0.5, %v889_v22  ;;  %v890_v51 = vadd.f32 %v839_v60, %v457_v13  ;;  %v882_v58 = vpop.f32.mrf.mxu1 }
 0x11c   : > { %v841_v54 = vpop.f32.mrf.mxu0  ;;  %v892_v11 = vadd.f32 %v882_v58, %v530_v48 }
 0x11d   : > { %2519 = vtanh.f32 %v897_v10  ;;  %v898_v63 = vmul.f32 0.5, %v890_v51  ;;  %v893_v5 = vadd.f32 %v841_v54, %v459_v49  ;;  %v884_v0 = vpop.f32.mrf.mxu1  ;;  %v528_v10 = vadd.f32 %v3036_v55, %v3053_v4 }
 0x11e   : > { %v843_v56 = vpop.f32.mrf.mxu0  ;;  %v895_v48 = vadd.f32 %v884_v0, %v532_v1  ;;  %v601_v0 = vld [vmem:[#allocation7 + $0x8] sm:$0xff] }
 0x11f   : > { %2521 = vtanh.f32 %v898_v63  ;;  %v900_v6 = vmul.f32 0.5, %v893_v5  ;;  %v894_v12 = vadd.f32 %v843_v56, %v461_v59  ;;  %v886_v53 = vpop.f32.mrf.mxu1  ;;  %v891_v7 = vadd.f32 %v880_v33, %v528_v10 }
 0x120   : > { %v896_v57 = vadd.f32 %v886_v53, %v534_v61  ;;  %v902_v13 = vmul.f32 0.5, %v895_v48 }
 0x121   : > { %2523 = vtanh.f32 %v900_v6  ;;  %v901_v3 = vmul.f32 0.5, %v894_v12  ;;  %v899_v22 = vmul.f32 0.5, %v891_v7 }
 0x122   : > { %2525 = vtanh.f32 %v892_v11  ;;  %v600_v11 = vld [vmem:[#allocation7] sm:$0xff] }
 0x123   : > { %2527 = vtanh.f32 %v901_v3 }
 0x124   : > { %2529 = vtanh.f32 %v896_v57 }
 0x125   : > { %2531 = vtanh.f32 %v899_v22 }
 0x126   : > { %2533 = vtanh.f32 %v902_v13 }
 0x12a   : > { %v2520_v60 = vpop.eup %2519 }
 0x12b   : > { %v909_v5 = vadd.f32 1.0, %v2520_v60 }
 0x12c   : > { %v2522_v58 = vpop.eup %2521 }
 0x12d   : > { %v915_v2 = vmul.f32 0.5, %v909_v5  ;;  %v910_v8 = vadd.f32 1.0, %v2522_v58 }
 0x12e   : > { %v2524_v49 = vpop.eup %2523 }
 0x12f   : > { %v2526_v51 = vpop.eup %2525  ;;  %v916_v53 = vmul.f32 0.5, %v910_v8  ;;  %v912_v54 = vadd.f32 1.0, %v2524_v49  ;;  %v3321_v8 = vmov 0  }
 0x130   : > { %v2528_v55 = vpop.eup %2527  ;;  %v925_v62 = vmul.f32 %v2526_v51, %v915_v2 }
 0x131   : > { %v923_v59 = vmul.f32 %v916_v53, %v600_v11  ;;  %v918_v4 = vmul.f32 0.5, %v912_v54  ;;  %v913_v33 = vadd.f32 1.0, %v2528_v55  ;;  %v2530_v6 = vpop.eup %2529 }
 0x132   : > { %v2532_v57 = vpop.eup %2531 }
 0x133   : > { %v3129_v63 = vadd.f32 %v925_v62, %v923_v59  ;;  %v919_v56 = vmul.f32 0.5, %v913_v33  ;;  %v926_v61 = vmul.f32 %v2530_v6, %v918_v4  ;;  %v2534_v10 = vpop.eup %2533  ;;  %v911_v1 = vadd.f32 1.0, %v2532_v57 }
 0x134   : > { %v914_v7 = vadd.f32 1.0, %v2534_v10 }
 0x135   : > { %v924_v12 = vmul.f32 %v919_v56, %v601_v0  ;;  %2535 = vtanh.f32 %v3129_v63  ;;  %v917_v60 = vmul.f32 0.5, %v911_v1 }
 0x136   : > { %v920_v5 = vmul.f32 0.5, %v914_v7 }
 0x137   : > { %v3132_v3 = vadd.f32 %v926_v61, %v924_v12 }
 0x139   : > { %2537 = vtanh.f32 %v3132_v3 }
 0x142   : > { %v2536_v48 = vpop.eup %2535 }
 0x143   : > { %v931_v58 = vmul.f32 %v2536_v48, %v917_v60  ;;  %v2476_v60 = vld [vmem:[#allocation3 + $0xec] ss:$16 sps:$4 sm:$0xff]  }
 0x146   : > { %v2538_v22 = vpop.eup %2537 }
 0x147   : > { %v932_v13 = vmul.f32 %v2538_v22, %v920_v5  ;;  %v2471_v5 = vld [vmem:[#allocation3 + $0xe0] ss:$16 sps:$4 sm:$0xff]   ;;  %v2474_v22 = vld [vmem:[#allocation3 + $0xe8] ss:$16 sps:$4 sm:$0xff]  }
 0x149   : > { %v2334_v2 = vpack.c.bf16 %v932_v13, %v931_v58  ;;  %v2479_v58 = vld [vmem:[#allocation3 + $0xc4] ss:$16 sps:$4 sm:$0xff]   ;;  %v2482_v13 = vld [vmem:[#allocation3 + $0xcc] ss:$16 sps:$4 sm:$0xff]  }
 0x14b   : > { %2335 = vst [vmem:[%s2850_s24] sm:$0xff] %v2334_v2   ;;  %1185 = vmatmul.mubr.bf16.vlgmr.msra.gmra.mxu0 %v2334_v2  ;;  %1228 = vmatmul.mubr.bf16.vlgmr.msra.gmra.mxu1 %v2334_v2  ;;  %v2477_v2 = vld [vmem:[#allocation3 + $0xc0] ss:$16 sps:$4 sm:$0xff]  }
 0x14c   : > { %1502 = vmatpush1.bf16.msra.mxu0 %v2883_v14  ;;  %1545 = vmatpush1.bf16.msra.mxu1 %v2887_v16 }
 0x14d   : > { %1503 = vmatprep.subr.bf16.mxu0 %v2894_v18  ;;  %1546 = vmatprep.subr.bf16.mxu1 %v2900_v20 }
 0x14e   : > { %1533 = vmatprep.mubr.bf16.mxu0 %v3321_v8  ;;  %1576 = vmatprep.mubr.bf16.mxu1 %v3321_v8 }
 0x150   : > { %1504 = vmatpush1.bf16.msra.mxu0 %v2898_v19  ;;  %1547 = vmatpush1.bf16.msra.mxu1 %v2904_v21 }
 0x151   : > { %1505 = vmatprep.subr.bf16.mxu0 %v2910_v23  ;;  %1548 = vmatprep.subr.bf16.mxu1 %v2915_v25 }
 0x154   : > { %1506 = vmatpush1.bf16.msra.mxu0 %v2913_v24  ;;  %1549 = vmatpush1.bf16.msra.mxu1 %v2919_v26 }
 0x155   : > { %1507 = vmatprep.subr.bf16.mxu0 %v2921_v27  ;;  %1550 = vmatprep.subr.bf16.mxu1 %v2926_v28 }
 0x158   : > { %1508 = vmatpush1.bf16.msra.mxu0 %v2929_v29  ;;  %1551 = vmatpush1.bf16.msra.mxu1 %v2934_v30 }
 0x159   : > { %1509 = vmatprep.subr.bf16.mxu0 %v2936_v31  ;;  %1552 = vmatprep.subr.bf16.mxu1 %v2940_v32 }
 0x15c   : > { %1510 = vmatpush1.bf16.msra.mxu0 %v2944_v34  ;;  %1553 = vmatpush1.bf16.msra.mxu1 %v2948_v35  ;;  %v3322_v35 = vld [vmem:[#allocation24_spill] sm:$0xff] }
 0x15d   : > { %1511 = vmatprep.subr.bf16.mxu0 %v2950_v36  ;;  %1554 = vmatprep.subr.bf16.mxu1 %v2953_v37  ;;  %v3323_v37 = vld [vmem:[#allocation22_spill] sm:$0xff] }
 0x160   : > { %1512 = vmatpush1.bf16.msra.mxu0 %v2957_v38  ;;  %1555 = vmatpush1.bf16.msra.mxu1 %v2960_v39  ;;  %v3324_v39 = vld [vmem:[#allocation23_spill] sm:$0xff] }
 0x161   : > { %1513 = vmatprep.subr.bf16.mxu0 %v2965_v40  ;;  %1556 = vmatprep.subr.bf16.mxu1 %v2969_v41 }
 0x164   : > { %1514 = vmatpush1.bf16.msra.mxu0 %v2972_v43  ;;  %1557 = vmatpush1.bf16.msra.mxu1 %v2975_v44 }
 0x165   : > { %1515 = vmatprep.subr.bf16.mxu0 %v2977_v45  ;;  %1558 = vmatprep.subr.bf16.mxu1 %v2979_v46 }
 0x168   : > { %1516 = vmatpush1.bf16.msra.mxu0 %v2984_v47  ;;  %1559 = vmatpush1.bf16.msra.mxu1 %v2988_v50 }
 0x169   : > { %1893 = vmatprep.subr.bf16.mxu1 %v2476_v60 }
 0x20b   : > { %v1186_v14 = vpop.f32.mrf.mxu0  ;;  %v1229_v16 = vpop.f32.mrf.mxu1 }
 0x20c   : > { %v1238_v18 = vadd.f32 %v1186_v14, %v3057_v9  ;;  %v1240_v38 = vadd.f32 %v1229_v16, %v3323_v37  ;;  %v2480_v14 = vld [vmem:[#allocation3 + $0xc8] ss:$16 sps:$4 sm:$0xff]   ;;  %v2485_v16 = vld [vmem:[#allocation3 + $0xa4] ss:$16 sps:$4 sm:$0xff]  }
 0x20d   : > { %v1188_v19 = vpop.f32.mrf.mxu0  ;;  %v1231_v20 = vpop.f32.mrf.mxu1  ;;  %v2510_v37 = vld [vmem:[#allocation3 + $0x28] ss:$16 sps:$4 sm:$0xff]  }
 0x20e   : > { %v1246_v21 = vmul.f32 0.5, %v1238_v18  ;;  %v1239_v23 = vadd.f32 %v1188_v19, %v3062_v15  ;;  %v1241_v24 = vadd.f32 %v1231_v20, %v3065_v17  ;;  %v1248_v45 = vmul.f32 0.5, %v1240_v38  ;;  %v2488_v18 = vld [vmem:[#allocation3 + $0xac] ss:$16 sps:$4 sm:$0xff]   ;;  %v2483_v19 = vld [vmem:[#allocation3 + $0xa0] ss:$16 sps:$4 sm:$0xff]  }
 0x20f   : > { %v1190_v25 = vpop.f32.mrf.mxu0  ;;  %v1233_v26 = vpop.f32.mrf.mxu1  ;;  %v2491_v20 = vld [vmem:[#allocation3 + $0x84] ss:$16 sps:$4 sm:$0xff]  }
 0x210   : > { %2539 = vtanh.f32 %v1246_v21  ;;  %v1247_v27 = vmul.f32 0.5, %v1239_v23  ;;  %v1242_v28 = vadd.f32 %v1190_v25, %v3067_v42  ;;  %v1244_v40 = vadd.f32 %v1233_v26, %v3324_v39  ;;  %v2494_v21 = vld [vmem:[#allocation3 + $0x8c] ss:$16 sps:$4 sm:$0xff]   ;;  %v2489_v23 = vld [vmem:[#allocation3 + $0x80] ss:$16 sps:$4 sm:$0xff]  }
 0x211   : > { %v1192_v29 = vpop.f32.mrf.mxu0  ;;  %v1235_v30 = vpop.f32.mrf.mxu1  ;;  %v2497_v25 = vld [vmem:[#allocation3 + $0x64] ss:$16 sps:$4 sm:$0xff]   ;;  %v2500_v26 = vld [vmem:[#allocation3 + $0x6c] ss:$16 sps:$4 sm:$0xff]  }
 0x212   : > { %2541 = vtanh.f32 %v1247_v27  ;;  %v1249_v31 = vmul.f32 0.5, %v1242_v28  ;;  %v1243_v32 = vadd.f32 %v1192_v29, %v3072_v52  ;;  %v1245_v36 = vadd.f32 %v1235_v30, %v3322_v35  ;;  %v2495_v27 = vld [vmem:[#allocation3 + $0x60] ss:$16 sps:$4 sm:$0xff]   ;;  %v2498_v28 = vld [vmem:[#allocation3 + $0x68] ss:$16 sps:$4 sm:$0xff]  }
 0x213   : > { %2543 = vtanh.f32 %v1241_v24  ;;  %v1251_v9 = vmul.f32 0.5, %v1244_v40  ;;  %v2492_v24 = vld [vmem:[#allocation3 + $0x88] ss:$16 sps:$4 sm:$0xff]   ;;  %v2503_v29 = vld [vmem:[#allocation3 + $0x44] ss:$16 sps:$4 sm:$0xff]  }
 0x214   : > { %2545 = vtanh.f32 %v1249_v31  ;;  %v1250_v34 = vmul.f32 0.5, %v1243_v32  ;;  %v2506_v30 = vld [vmem:[#allocation3 + $0x4c] ss:$16 sps:$4 sm:$0xff]   ;;  %v2501_v31 = vld [vmem:[#allocation3 + $0x40] ss:$16 sps:$4 sm:$0xff]  }
 0x215   : > { %v2504_v32 = vld [vmem:[#allocation3 + $0x48] ss:$16 sps:$4 sm:$0xff]   ;;  %v2512_v35 = vld [vmem:[#allocation3 + $0x2c] ss:$16 sps:$4 sm:$0xff]   ;;  %v2515_v38 = vld [vmem:[#allocation3 + $0x4] ss:$16 sps:$4 sm:$0xff]  }
 0x216   : > { %2547 = vtanh.f32 %v1250_v34  ;;  %v2509_v34 = vld [vmem:[#allocation3 + $0x24] ss:$16 sps:$4 sm:$0xff]   ;;  %v2518_v39 = vld [vmem:[#allocation3 + $0xc] ss:$16 sps:$4 sm:$0xff]   ;;  %v2513_v40 = vld [vmem:[#allocation3] ss:$16 sps:$4 sm:$0xff]  }
 0x217   : > { %2549 = vtanh.f32 %v1245_v36  ;;  %v2507_v36 = vld [vmem:[#allocation3 + $0x20] ss:$16 sps:$4 sm:$0xff]  }
 0x218   : > { %2551 = vtanh.f32 %v1248_v45  ;;  %v3325_v45 = vld [vmem:[#allocation25_spill] sm:$0xff] }
 0x219   : > { %2553 = vtanh.f32 %v1251_v9 }
 0x21d   : > { %v2540_v41 = vpop.eup %2539 }
 0x21e   : > { %v1258_v43 = vadd.f32 1.0, %v2540_v41  ;;  %v2516_v41 = vld [vmem:[#allocation3 + $0x8] ss:$16 sps:$4 sm:$0xff]  }
 0x21f   : > { %v2542_v44 = vpop.eup %2541 }
 0x220   : > { %v2544_v46 = vpop.eup %2543  ;;  %v1264_v47 = vmul.f32 0.5, %v1258_v43  ;;  %v1259_v50 = vadd.f32 1.0, %v2542_v44 }
 0x221   : > { %v2546_v15 = vpop.eup %2545 }
 0x222   : > { %v1265_v17 = vmul.f32 0.5, %v1259_v50  ;;  %v1274_v42 = vmul.f32 %v2544_v46, %v1264_v47  ;;  %v1261_v52 = vadd.f32 1.0, %v2546_v15  ;;  %v3326_v15 = vld [vmem:[#allocation27_spill] sm:$0xff] }
 0x223   : > { %v2548_v49 = vpop.eup %2547 }
 0x224   : > { %v1272_v11 = vmul.f32 %v1265_v17, %v3129_v63  ;;  %v1267_v51 = vmul.f32 0.5, %v1261_v52  ;;  %v1262_v53 = vadd.f32 1.0, %v2548_v49  ;;  %v2550_v54 = vpop.eup %2549 }
 0x225   : > { %v2552_v0 = vpop.eup %2551 }
 0x226   : > { %v3177_v55 = vadd.f32 %v1274_v42, %v1272_v11  ;;  %v1268_v59 = vmul.f32 0.5, %v1262_v53  ;;  %v1275_v62 = vmul.f32 %v2550_v54, %v1267_v51  ;;  %v2554_v56 = vpop.eup %2553  ;;  %v1260_v63 = vadd.f32 1.0, %v2552_v0  ;;  %v3327_v42 = vld [vmem:[#allocation28_spill] sm:$0xff]  ;;  %v3328_v53 = vld [vmem:[#allocation29_spill] sm:$0xff]  ;;  %v3329_v0 = vld [vmem:[#allocation31_spill] sm:$0xff] }
 0x227   : > { %v1263_v6 = vadd.f32 1.0, %v2554_v56 }
 0x228   : > { %v1273_v4 = vmul.f32 %v1268_v59, %v3132_v3  ;;  %2555 = vtanh.f32 %v3177_v55  ;;  %v1266_v61 = vmul.f32 0.5, %v1260_v63  ;;  %v2473_v3 = vld [vmem:[#allocation3 + $0xe4] ss:$16 sps:$4 sm:$0xff]  }
 0x229   : > { %v1269_v57 = vmul.f32 0.5, %v1263_v6  ;;  %1850 = vmatprep.subr.bf16.mxu0 %v2473_v3  ;;  %v3330_v6 = vld [vmem:[#allocation32_spill] sm:$0xff] }
 0x22a   : > { %v3181_v33 = vadd.f32 %v1275_v62, %v1273_v4 }
 0x22c   : > { %2557 = vtanh.f32 %v3181_v33 }
 0x235   : > { %v2556_v12 = vpop.eup %2555 }
 0x236   : > { %v1280_v1 = vmul.f32 %v2556_v12, %v1266_v61  ;;  %v3331_v61 = vld [vmem:[#allocation26_spill] sm:$0xff] }
 0x239   : > { %v2558_v10 = vpop.eup %2557 }
 0x23a   : > { %v1281_v7 = vmul.f32 %v2558_v10, %v1269_v57  ;;  %v3332_v10 = vld [vmem:[#allocation30_spill] sm:$0xff] }
 0x23c   : > { %v2339_v48 = vpack.c.bf16 %v1281_v7, %v1280_v1 }
 0x23e   : > { %2351 = vst [vmem:[%s2850_s24 + $0x8] sm:$0xff] %v2339_v48   ;;  %1534 = vmatmul.mubr.bf16.vlgmr.msra.gmra.mxu0 %v2339_v48  ;;  %1577 = vmatmul.mubr.bf16.vlgmr.msra.gmra.mxu1 %v2339_v48 }
 0x23f   : > { %1882 = vmatprep.mubr.bf16.mxu0 %v3321_v8  ;;  %1925 = vmatprep.mubr.bf16.mxu1 %v3321_v8  ;;  %v2486_v8 = vld [vmem:[#allocation3 + $0xa8] ss:$16 sps:$4 sm:$0xff]  }
 0x240   : > { %1851 = vmatpush1.bf16.msra.mxu0 %v2471_v5  ;;  %1894 = vmatpush1.bf16.msra.mxu1 %v2474_v22 }
 0x241   : > { %1852 = vmatprep.subr.bf16.mxu0 %v2479_v58  ;;  %1895 = vmatprep.subr.bf16.mxu1 %v2482_v13 }
 0x244   : > { %1853 = vmatpush1.bf16.msra.mxu0 %v2477_v2  ;;  %1896 = vmatpush1.bf16.msra.mxu1 %v2480_v14 }
 0x245   : > { %1854 = vmatprep.subr.bf16.mxu0 %v2485_v16  ;;  %1897 = vmatprep.subr.bf16.mxu1 %v2488_v18 }
 0x248   : > { %1855 = vmatpush1.bf16.msra.mxu0 %v2483_v19  ;;  %1898 = vmatpush1.bf16.msra.mxu1 %v2486_v8 }
 0x249   : > { %1856 = vmatprep.subr.bf16.mxu0 %v2491_v20  ;;  %1899 = vmatprep.subr.bf16.mxu1 %v2494_v21 }
 0x24c   : > { %1857 = vmatpush1.bf16.msra.mxu0 %v2489_v23  ;;  %1900 = vmatpush1.bf16.msra.mxu1 %v2492_v24 }
 0x24d   : > { %1858 = vmatprep.subr.bf16.mxu0 %v2497_v25  ;;  %1901 = vmatprep.subr.bf16.mxu1 %v2500_v26 }
 0x250   : > { %1859 = vmatpush1.bf16.msra.mxu0 %v2495_v27  ;;  %1902 = vmatpush1.bf16.msra.mxu1 %v2498_v28 }
 0x251   : > { %1860 = vmatprep.subr.bf16.mxu0 %v2503_v29  ;;  %1903 = vmatprep.subr.bf16.mxu1 %v2506_v30 }
 0x254   : > { %1861 = vmatpush1.bf16.msra.mxu0 %v2501_v31  ;;  %1904 = vmatpush1.bf16.msra.mxu1 %v2504_v32 }
 0x255   : > { %1862 = vmatprep.subr.bf16.mxu0 %v2509_v34  ;;  %1905 = vmatprep.subr.bf16.mxu1 %v2512_v35 }
 0x258   : > { %1863 = vmatpush1.bf16.msra.mxu0 %v2507_v36  ;;  %1906 = vmatpush1.bf16.msra.mxu1 %v2510_v37 }
 0x259   : > { %1864 = vmatprep.subr.bf16.mxu0 %v2515_v38  ;;  %1907 = vmatprep.subr.bf16.mxu1 %v2518_v39 }
 0x25c   : > { %1865 = vmatpush1.bf16.msra.mxu0 %v2513_v40  ;;  %1908 = vmatpush1.bf16.msra.mxu1 %v2516_v41  ;;  %v3333_v41 = vld [vmem:[#allocation33_spill] sm:$0xff] }
 0x2fe   : > { %v1535_v43 = vpop.f32.mrf.mxu0  ;;  %v1578_v44 = vpop.f32.mrf.mxu1 }
 0x2ff   : > { %v1587_v46 = vadd.f32 %v1535_v43, %v3325_v45  ;;  %v1589_v57 = vadd.f32 %v1578_v44, %v3331_v61  ;;  %v3340_v61 = vld [vmem:[#allocation38_spill] sm:$0xff] }
 0x300   : > { %v1537_v47 = vpop.f32.mrf.mxu0  ;;  %v1580_v50 = vpop.f32.mrf.mxu1 }
 0x301   : > { %v1595_v9 = vmul.f32 0.5, %v1587_v46  ;;  %v1588_v17 = vadd.f32 %v1537_v47, %v3326_v15  ;;  %v1590_v52 = vadd.f32 %v1580_v50, %v3327_v42  ;;  %v1597_v60 = vmul.f32 0.5, %v1589_v57  ;;  %v3334_v47 = vld [vmem:[#allocation35_spill] sm:$0xff] }
 0x302   : > { %v1539_v49 = vpop.f32.mrf.mxu0  ;;  %v1582_v11 = vpop.f32.mrf.mxu1 }
 0x303   : > { %2559 = vtanh.f32 %v1595_v9  ;;  %v1596_v51 = vmul.f32 0.5, %v1588_v17  ;;  %v1591_v54 = vadd.f32 %v1539_v49, %v3328_v53  ;;  %v1593_v1 = vadd.f32 %v1582_v11, %v3332_v10  ;;  %v3335_v9 = vld [vmem:[#allocation36_spill] sm:$0xff]  ;;  %v3336_v49 = vld [vmem:[#allocation37_spill] sm:$0xff] }
 0x304   : > { %v1541_v59 = vpop.f32.mrf.mxu0  ;;  %v1584_v62 = vpop.f32.mrf.mxu1 }
 0x305   : > { %2561 = vtanh.f32 %v1596_v51  ;;  %v1598_v4 = vmul.f32 0.5, %v1591_v54  ;;  %v1592_v56 = vadd.f32 %v1541_v59, %v3329_v0  ;;  %v1594_v12 = vadd.f32 %v1584_v62, %v3330_v6  ;;  %v3337_v59 = vld [vmem:[#allocation39_spill] sm:$0xff]  ;;  %v3338_v0 = vld [vmem:[#allocation40_spill] sm:$0xff] }
 0x306   : > { %2563 = vtanh.f32 %v1590_v52  ;;  %v1600_v13 = vmul.f32 0.5, %v1593_v1 }
 0x307   : > { %2565 = vtanh.f32 %v1598_v4  ;;  %v1599_v63 = vmul.f32 0.5, %v1592_v56 }
 0x309   : > { %2567 = vtanh.f32 %v1599_v63  ;;  %v3339_v63 = vld [vmem:[#allocation34_spill] sm:$0xff] }
 0x30a   : > { %2569 = vtanh.f32 %v1594_v12 }
 0x30b   : > { %2571 = vtanh.f32 %v1597_v60 }
 0x30c   : > { %2573 = vtanh.f32 %v1600_v13 }
 0x310   : > { %v2560_v7 = vpop.eup %2559 }
 0x311   : > { %v1607_v48 = vadd.f32 1.0, %v2560_v7 }
 0x312   : > { %v2562_v3 = vpop.eup %2561 }
 0x313   : > { %v2564_v5 = vpop.eup %2563  ;;  %v1613_v22 = vmul.f32 0.5, %v1607_v48  ;;  %v1608_v58 = vadd.f32 1.0, %v2562_v3 }
 0x314   : > { %v2566_v2 = vpop.eup %2565 }
 0x315   : > { %v1614_v14 = vmul.f32 0.5, %v1608_v58  ;;  %v1623_v16 = vmul.f32 %v2564_v5, %v1613_v22  ;;  %v1610_v18 = vadd.f32 1.0, %v2566_v2 }
 0x316   : > { %v2568_v19 = vpop.eup %2567 }
 0x317   : > { %v1621_v8 = vmul.f32 %v1614_v14, %v3177_v55  ;;  %v1616_v20 = vmul.f32 0.5, %v1610_v18  ;;  %v1611_v21 = vadd.f32 1.0, %v2568_v19  ;;  %v2570_v23 = vpop.eup %2569 }
 0x318   : > { %v2572_v29 = vpop.eup %2571 }
 0x319   : > { %v1625_v24 = vadd.f32 %v1623_v16, %v1621_v8  ;;  %v1617_v25 = vmul.f32 0.5, %v1611_v21  ;;  %v1624_v26 = vmul.f32 %v2570_v23, %v1616_v20  ;;  %v2574_v30 = vpop.eup %2573  ;;  %v1609_v31 = vadd.f32 1.0, %v2572_v29 }
 0x31a   : > { %v1612_v32 = vadd.f32 1.0, %v2574_v30 }
 0x31b   : > { %v1622_v27 = vmul.f32 %v1617_v25, %v3181_v33  ;;  %2575 = vtanh.f32 %v1625_v24  ;;  %v1615_v34 = vmul.f32 0.5, %v1609_v31 }
 0x31c   : > { %v1618_v35 = vmul.f32 0.5, %v1612_v32 }
 0x31d   : > { %v3197_v28 = vadd.f32 %v1624_v26, %v1622_v27 }
 0x31f   : > { %2577 = vtanh.f32 %v3197_v28 }
 0x328   : > { %v2576_v55 = vpop.eup %2575 }
 0x329   : > { %v1629_v37 = vmul.f32 %v2576_v55, %v1615_v34 }
 0x32c   : > { %v2578_v36 = vpop.eup %2577 }
 0x32d   : > { %v1630_v38 = vmul.f32 %v2578_v36, %v1618_v35 }
 0x32f   : > { %v2344_v39 = vpack.c.bf16 %v1630_v38, %v1629_v37 }
 0x331   : > { %2352 = vst [vmem:[%s2850_s24 + $0x10] sm:$0xff] %v2344_v39   ;;  %1883 = vmatmul.mubr.bf16.vlgmr.msra.gmra.mxu0 %v2344_v39  ;;  %1926 = vmatmul.mubr.bf16.vlgmr.msra.gmra.mxu1 %v2344_v39 }
 0x3f1   : > { %v1884_v33 = vpop.f32.mrf.mxu0  ;;  %v1927_v40 = vpop.f32.mrf.mxu1 }
 0x3f2   : > { %v1936_v43 = vadd.f32 %v1884_v33, %v3333_v41  ;;  %v1938_v6 = vadd.f32 %v1927_v40, %v3339_v63 }
 0x3f3   : > { %v1886_v44 = vpop.f32.mrf.mxu0  ;;  %v1929_v45 = vpop.f32.mrf.mxu1 }
 0x3f4   : > { %v1944_v46 = vmul.f32 0.5, %v1936_v43  ;;  %v1937_v50 = vadd.f32 %v1886_v44, %v3334_v47  ;;  %v1939_v15 = vadd.f32 %v1929_v45, %v3335_v9  ;;  %v1946_v12 = vmul.f32 0.5, %v1938_v6 }
 0x3f5   : > { %v1888_v17 = vpop.f32.mrf.mxu0  ;;  %v1931_v42 = vpop.f32.mrf.mxu1 }
 0x3f6   : > { %2579 = vtanh.f32 %v1944_v46  ;;  %v1945_v52 = vmul.f32 0.5, %v1937_v50  ;;  %v1940_v11 = vadd.f32 %v1888_v17, %v3336_v49  ;;  %v1942_v57 = vadd.f32 %v1931_v42, %v3340_v61 }
 0x3f7   : > { %v1890_v51 = vpop.f32.mrf.mxu0  ;;  %v1933_v53 = vpop.f32.mrf.mxu1 }
 0x3f8   : > { %2581 = vtanh.f32 %v1945_v52  ;;  %v1947_v54 = vmul.f32 0.5, %v1940_v11  ;;  %v1941_v62 = vadd.f32 %v1890_v51, %v3337_v59  ;;  %v1943_v56 = vadd.f32 %v1933_v53, %v3338_v0 }
 0x3f9   : > { %2583 = vtanh.f32 %v1939_v15  ;;  %v1949_v5 = vmul.f32 0.5, %v1942_v57 }
 0x3fa   : > { %2585 = vtanh.f32 %v1947_v54  ;;  %v1948_v4 = vmul.f32 0.5, %v1941_v62 }
 0x3fc   : > { %2587 = vtanh.f32 %v1948_v4 }
 0x3fd   : > { %2589 = vtanh.f32 %v1943_v56 }
 0x3fe   : > { %2591 = vtanh.f32 %v1946_v12 }
 0x3ff   : > { %2593 = vtanh.f32 %v1949_v5 }
 0x403   : > { %v2580_v10 = vpop.eup %2579 }
 0x404   : > { %v1956_v1 = vadd.f32 1.0, %v2580_v10 }
 0x405   : > { %v2582_v7 = vpop.eup %2581 }
 0x406   : > { %v2584_v48 = vpop.eup %2583  ;;  %v1962_v3 = vmul.f32 0.5, %v1956_v1  ;;  %v1957_v60 = vadd.f32 1.0, %v2582_v7 }
 0x407   : > { %v2586_v22 = vpop.eup %2585 }
 0x408   : > { %v1963_v58 = vmul.f32 0.5, %v1957_v60  ;;  %v1972_v13 = vmul.f32 %v2584_v48, %v1962_v3  ;;  %v1959_v2 = vadd.f32 1.0, %v2586_v22 }
 0x409   : > { %v2588_v14 = vpop.eup %2587 }
 0x40a   : > { %v1970_v16 = vmul.f32 %v1963_v58, %v1625_v24  ;;  %v1965_v18 = vmul.f32 0.5, %v1959_v2  ;;  %v1960_v19 = vadd.f32 1.0, %v2588_v14  ;;  %v2590_v8 = vpop.eup %2589 }
 0x40b   : > { %v2592_v27 = vpop.eup %2591 }
 0x40c   : > { %v1974_v20 = vadd.f32 %v1972_v13, %v1970_v16  ;;  %v1966_v21 = vmul.f32 0.5, %v1960_v19  ;;  %v1973_v23 = vmul.f32 %v2590_v8, %v1965_v18  ;;  %v1958_v29 = vadd.f32 1.0, %v2592_v27  ;;  %v2594_v30 = vpop.eup %2593 }
 0x40d   : > { %v1961_v24 = vadd.f32 1.0, %v2594_v30 }
 0x40e   : > { %2595 = vtanh.f32 %v1974_v20  ;;  %1982 = vst [vmem:[#allocation7] sm:$0xff] %v1974_v20  ;;  %v1971_v25 = vmul.f32 %v1966_v21, %v3197_v28  ;;  %v1964_v31 = vmul.f32 0.5, %v1958_v29 }
 0x40f   : > { %v1967_v34 = vmul.f32 0.5, %v1961_v24 }
 0x410   : > { %v1975_v26 = vadd.f32 %v1973_v23, %v1971_v25 }
 0x412   : > { %2597 = vtanh.f32 %v1975_v26  ;;  %1983 = vst [vmem:[#allocation7 + $0x8] sm:$0xff] %v1975_v26 }
 0x41b   : > { %v2596_v32 = vpop.eup %2595 }
 0x41c   : > { %v1978_v55 = vmul.f32 %v2596_v32, %v1964_v31 }
 0x41e   : > { %1980 = vst [vmem:[#allocation6] sm:$0xff] %v1978_v55 }
 0x41f   : > { %v2598_v35 = vpop.eup %2597 }
 0x420   : > { %v1979_v36 = vmul.f32 %v2598_v35, %v1967_v34  ;;  %1997 = sbr.rel (%p2310_p4) target bundleno = 1067 (0x42b), region = 82 }
 0x422   : > { %1981 = vst [vmem:[#allocation6 + $0x8] sm:$0xff] %v1979_v36  ;;  %v2349_v37 = vpack.c.bf16 %v1979_v36, %v1978_v55 }
 0x424   : > { %2353 = vst [vmem:[%s2850_s24 + $0x18] sm:$0xff] %v2349_v37  }
 0x425   : > { %v1998_v28 = vld [vmem:[#allocation6] sm:$0xff]  ;;  %v2002_v39 = vld [vmem:[#allocation7] sm:$0xff]  ;;  %v2003_v33 = vld [vmem:[#allocation7 + $0x8] sm:$0xff] }
 0x426   : > { %2000 = vst [vmem:[#allocation10] sm:$0xff] %v1998_v28  ;;  %2004 = vst [vmem:[#allocation12] sm:$0xff] %v2002_v39 }
 0x427   : > { %2005 = vst [vmem:[#allocation12 + $0x8] sm:$0xff] %v2003_v33 }
 0x429   : > { %v1999_v38 = vld [vmem:[#allocation6 + $0x8] sm:$0xff] }
 0x42a   : > { %2001 = vst [vmem:[#allocation10 + $0x8] sm:$0xff] %v1999_v38 }
 0x42b PF: > { %s2739_s10 = smov [#allocation10]  }
 0x42c   : > { %s2033_s12 = sshll.u32 %s2739_s10, 4  ;;  %s2034_s12 = int_to_ptr.vmem [resolvable:$true] %s2033_s12 }
 0x42d   : > { %s2619_s13 = scalar_lea.vmem %s2034_s12, 256  ;;  %p2626_p10 = scmp.lt.s32.totalorder %s2034_s12, %s2034_s12 }
 0x42e   : > { %p2620_p7 = scmp.ne.s32.totalorder %s2034_s12, %s2619_s13  ;;  %p2627_p11 = scmp.lt.s32.totalorder %s2619_s13, %s2619_s13 }
 0x430   : > { %p2621_p8 = pnand %p2620_p7, %p130_p2  ;;  %p2628_p12 = por %p2627_p11, %p2626_p10 }
 0x432   : > { %p2622_p9 = pneg %p2621_p8 }
 0x434   : > { %p2629_p13 = pnand %p2628_p12, %p2622_p9 }
 0x436   : > { %2632 = shalt.err (!%p2629_p13)
}
 0x437   : > { %s2740_s18 = smov 128   ;;  %s2741_s19 = smov 8  }
 0x438   : > { %2356 = dma.vmem_to_hbm [thread:$0]  (%p130_p2), %s2034_s12, 256, %s3294_s7, [#allocation11], %s2740_s18, %s2740_s18, %s2741_s19  }
 0x439   : > { %s2330_s22 = sshll.u32 %s2812_s9, 9  ;;  %s2020_s25 = sshll.u32 %s2850_s24, 4  ;;  %s3229_s25 = int_to_ptr.vmem [resolvable:$true] %s2020_s25 }
 0x43a   : > { %s3227_s10 = scalar_lea.hbm %s3293_s6, %s2330_s22  ;;  %s3233_s13 = scalar_lea.sflag [#allocation9], %s237_s17 }
 0x43b   : > { %s2643_s0 = scalar_lea.vmem %s3229_s25, 512  ;;  %s2742_s12 = smov [#allocation8]  }
 0x43c   : > { %p2644_p0 = scmp.ne.s32.totalorder %s3229_s25, %s2643_s0  ;;  %s2647_s24 = sshll.u32 %s2742_s12, 4  ;;  %s2648_s24 = int_to_ptr.vmem [resolvable:$false] %s2647_s24 }
 0x43d   : > { %s2649_s20 = scalar_lea.vmem %s2648_s24, 1024  ;;  %p2650_p4 = scmp.lt.s32.totalorder %s3229_s25, %s2648_s24 }
 0x43e   : > { %p2645_p1 = pnand %p2644_p0, %p2831_p5  ;;  %p2651_p7 = scmp.lt.s32.totalorder %s2649_s20, %s2643_s0 }
 0x440   : > { %p2646_p3 = pneg %p2645_p1  ;;  %p2652_p8 = por %p2651_p7, %p2650_p4 }
 0x442   : > { %p2653_p9 = pnand %p2652_p8, %p2646_p3 }
 0x444   : > { %2656 = shalt.err (!%p2653_p9)
}
 0x445   : > { %s2657_s17 = scalar_lea.hbm %s3227_s10, 512  ;;  %s2661_s23 = scalar_lea.hbm %s3293_s6, 1024 }
 0x446   : > { %p2658_p10 = scmp.ne.s32.totalorder %s3227_s10, %s2657_s17  ;;  %p2662_p13 = scmp.lt.s32.totalorder %s3227_s10, %s3293_s6 }
 0x447   : > { %p2663_p0 = scmp.lt.s32.totalorder %s2661_s23, %s2657_s17 }
 0x448   : > { %p2659_p11 = pnand %p2658_p10, %p2831_p5 }
 0x449   : > { %p2664_p1 = por %p2663_p0, %p2662_p13 }
 0x44a   : > { %p2660_p12 = pneg %p2659_p11 }
 0x44c   : > { %p2665_p3 = pnand %p2664_p1, %p2660_p12 }
 0x44e   : > { %2668 = shalt.err (!%p2665_p3)
}
 0x44f   : > { %s2743_s0 = smov 64   ;;  %s2744_s24 = smov 4  }
 0x450   : > { %2354 = dma.vmem_to_hbm [thread:$0]  (%p2831_p5), %s3229_s25, 512, %s3227_s10, %s3233_s13, %s2743_s0, %s2743_s0, %s2744_s24  }
 0x451   : > { %s2745_s20 = smov [#allocation12]  }
 0x452   : > { %s2046_s21 = sshll.u32 %s2745_s20, 4  ;;  %s2047_s21 = int_to_ptr.vmem [resolvable:$true] %s2046_s21 }
 0x453   : > { %s2669_s22 = scalar_lea.vmem %s2047_s21, 256  ;;  %p2676_p9 = scmp.lt.s32.totalorder %s2047_s21, %s2047_s21 }
 0x454   : > { %p2670_p4 = scmp.ne.s32.totalorder %s2047_s21, %s2669_s22  ;;  %p2677_p10 = scmp.lt.s32.totalorder %s2669_s22, %s2669_s22 }
 0x456   : > { %p2671_p7 = pnand %p2670_p4, %p130_p2  ;;  %p2678_p11 = por %p2677_p10, %p2676_p9 }
 0x458   : > { %p2672_p8 = pneg %p2671_p7 }
 0x45a   : > { %p2679_p12 = pnand %p2678_p11, %p2672_p8 }
 0x45c   : > { %2682 = shalt.err (!%p2679_p12)
}
 0x45d   : > { %2358 = dma.vmem_to_hbm [thread:$0]  (%p130_p2), %s2047_s21, 256, %s3295_s8, [#allocation11], %s2740_s18, %s2740_s18, %s2741_s19  }
 0x45e   : > { %2714 = dma.done.wait (%p130_p2), [#allocation11], 512  }
 0x45f   : > { %2716 = vsyncadd (%p130_p2), [#allocation11], 4294966784 }
 0x460 PF: > { %p2372_p5 = scmp.ge.s32.totalorder %s2735_s30, 2  ;;  %s2069_s10 = sand.u32 1, %s2723_s27  }
 0x461   : > { %s2070_s13 = scalar_lea.sflag [#allocation9], %s2069_s10 }
 0x462   : > { %p2365_p13 = pnand %p2372_p5, %p2835_p6 }
 0x464   : > { %p2366_p0 = pneg %p2365_p13 }
 0x466   : > { %2718 = dma.done.wait (%p2366_p0), %s2070_s13, 512  }
 0x467   : > { %2720 = vsyncadd (%p2366_p0), %s2070_s13, 4294966784  ;;  %p20_p1 = scmp.ge.s32.totalorder %s2816_s11, 4   ;;  %s3341_s27 = smov %s2727_s28 }
 0x468   : > { %s3342_s28 = smov %s2731_s29  ;;  %s3343_s29 = smov %s2827_s14 }
 0x469   : > { %s3344_s30 = smov %s2816_s11  ;;  %22 = sbr.rel (!%p20_p1) target bundleno = 6 (0x6), region = 143 }
 0x46e   :  { %2075 = vsyncpa [#allocation9], 1 }
 0x46f   :  { %2077 = vsyncpa [#allocation9 + $0x1], 1 }
 0x470   :  { %2078 = vsyncpa [#allocation11], 1 }
 0x471   :  { %2079 = vsyncmov [#allocation4] }
 0x474   :  { %s2080_s30 = vpop.sfrf %2079 }
 0x475   :  { %p2320_p2 = scmp.ne.s32.totalorder %s2080_s30, 0 }
 0x477   :  { %2084 = shalt.err (%p2320_p2)  }
 0x478   :  { %2086 = vsyncmov [#allocation4 + $0x1] }
 0x47b   :  { %s2087_s9 = vpop.sfrf %2086 }
 0x47c   :  { %p2321_p6 = scmp.ne.s32.totalorder %s2087_s9, 0 }
 0x47e   :  { %2091 = shalt.err (%p2321_p6)  }

</bundles_post_ra>
